<compile_context>
chip_gen: v7x
topology: tpu7x:2x2x1
jax: 0.10.0
libtpu: 0.0.40
codegen_flags: <defaults>
</compile_context>

<pallas_src>
import jax
import jax.numpy as jnp
from jax import lax
from jax.experimental import pallas as pl
from jax.experimental.pallas import tpu as pltpu


GP = 128   # per-gate lane block width (r/z/n gate groups at lane offsets 0/128/256)
PB = 8     # batch padded to one full sublane tile


def _round_up(v, m):
    return -(-v // m) * m


# ----------------------------- kernel factory ---------------------------------
def _make_kernel(T, Cin, D, H):
    GW = 3 * GP                        # 384 lanes: [r | z | n], each GP wide
    H2 = 2 * H                         # fused fwd|bwd state width (== D for this model)
    VB = _round_up(D + H2, 8)          # vector-row block start inside the gate slab
    CB = _round_up(3 * Cin + D, 8)     # vector-row block start inside the channel slab

    def kernel(x3_ref, wg_ref, wc_ref, out_ref):
        f32 = jnp.float32

        # ---- unpack packed weight slabs (static slices: no runtime cost) --------
        wih   = wg_ref[0:D, :]                    # (D, 3GP)  fused fwd|bwd input weights
        whh   = wg_ref[D:D + H2, :]               # (2H, 3GP) block-diag recurrent weights
        bih   = wg_ref[VB:VB + 1, :]              # (1, 3GP)
        fmask = wg_ref[VB + 1:VB + 2, :] > 0.5    # (1, 3GP)  1 on fwd-direction gate lanes
        bhh8  = wg_ref[VB + 8:VB + 16, :]         # (PB, 3GP) recurrent bias, pre-replicated

        wc    = wc_ref[0:3 * Cin, :]              # (3*Cin, D) conv weights, BN scale folded
        wlin  = wc_ref[3 * Cin:3 * Cin + D, :]    # (D, D)
        bnb   = wc_ref[CB:CB + 1, :]              # (1, D)     folded BN bias
        blin  = wc_ref[CB + 1:CB + 2, :]          # (1, D)

        # ---- conv1d(k=3, pad=1, bias=False) + folded BN + ReLU: one im2col matmul
        feat = jnp.maximum(
            jnp.dot(x3_ref[...], wc, preferred_element_type=f32) + bnb, 0.0)   # (T*PB, D)

        # ---- fused fwd/bwd GRU input projection (gate blocks 128-lane aligned) --
        gx = jnp.dot(feat, wih, preferred_element_type=f32) + bih              # (T*PB, 3GP)

        # ---- fwd/bwd time selection hoisted out of the recurrence ---------------
        # fwd gate lanes take time t, bwd gate lanes take time T-1-t.
        gi_steps = [
            jnp.where(fmask,
                      gx[t * PB:(t + 1) * PB, :],
                      gx[(T - 1 - t) * PB:(T - t) * PB, :])
            for t in range(T)]

        # ---- bidirectional recurrence on the fused compact state h = [h_f | h_b]
        # T is small & static -> full unroll (whole-tile reads, vreg-aligned slices).
        # TODO(synk): switch to lax.fori_loop over a VMEM scratch if T grows past ~16.
        h = jnp.zeros((PB, H2), f32)
        for t in range(T):
            gi = gi_steps[t]                                                    # (PB, 3GP)
            gh = jnp.dot(h, whh, preferred_element_type=f32) + bhh8             # (PB, 3GP)
            rz = jax.nn.sigmoid(gi[:, :2 * GP] + gh[:, :2 * GP])   # fused r|z sigmoid
            n  = jnp.tanh(gi[:, 2 * GP:] + rz[:, :GP] * gh[:, 2 * GP:])
            z  = rz[:, GP:GP + H2]
            h  = (1.0 - z) * n[:, :H2] + z * h                                  # (PB, 2H)

        # ---- linear + tanh + clamp + L2-norm rescale (single exact rsqrt) -------
        y = jnp.tanh(jnp.dot(h, wlin, preferred_element_type=f32) + blin)       # (PB, D)
        y = jnp.clip(y, -2.0, 2.0)
        nrm2 = jnp.sum(y * y, axis=-1, keepdims=True)
        # Equivalent to y / clip(sqrt(n2),1e-8,5) * min(clip(.),1):
        #   scale = 1 if n2 <= 1 else rsqrt(min(n2, 25))
        scale = jnp.where(nrm2 <= 1.0, 1.0, lax.rsqrt(jnp.minimum(nrm2, 25.0)))
        out_ref[...] = y * scale

    return kernel


# ------------------------------ wrapper ----------------------------------------
def tpse_gst_forward(x, p):
    """x: (B, T, encoder_embedding_dim) float32 -> (B, 1, token_embedding_size)."""
    if x is None:
        return None
    B, T, Cin = x.shape
    D = p["conv_w"].shape[0]
    H = D // 2
    H2 = 2 * H
    assert H2 == D, "model assumes token_embedding_size == 2 * GRU hidden size"
    assert B <= PB, "TODO(synk): add a batch grid (dimension_semantics='parallel') for B > 8"
    GW = 3 * GP
    f32 = jnp.float32
    eps = 1e-5

    # --- fold BN (eval mode) into conv weights / bias ---
    bn_scale = p["bn_gamma"] / jnp.sqrt(p["bn_var"] + eps)
    bn_bias = p["bn_beta"] - p["bn_mean"] * bn_scale
    # conv weight (D, Cin, 3) -> (3*Cin, D), row index k*Cin + c, BN scale folded in
    wc = jnp.transpose(p["conv_w"], (2, 1, 0)).reshape(3 * Cin, D) * bn_scale[None, :]

    # --- 128-lane-aligned fused gate packing: gate g at lanes [g*GP, g*GP+2H) = [fwd|bwd]
    def gate_pack(a_f, a_b):
        rows = a_f.shape[0]
        out = jnp.zeros((rows, GW), f32)
        for g in range(3):
            out = out.at[:, g * GP:g * GP + H].set(a_f[:, g * H:(g + 1) * H])
            out = out.at[:, g * GP + H:g * GP + H2].set(a_b[:, g * H:(g + 1) * H])
        return out

    wih = gate_pack(p["w_ih_f"].T, p["w_ih_b"].T)                     # (D, GW)
    bih = gate_pack(p["b_ih_f"][None, :], p["b_ih_b"][None, :])       # (1, GW)
    bhh = gate_pack(p["b_hh_f"][None, :], p["b_hh_b"][None, :])       # (1, GW)

    # block-diagonal recurrent weights: rows 0:H act on h_f, rows H:2H on h_b
    whh = jnp.zeros((H2, GW), f32)
    wf, wb = p["w_hh_f"].T, p["w_hh_b"].T                             # (H, 3H)
    for g in range(3):
        whh = whh.at[0:H, g * GP:g * GP + H].set(wf[:, g * H:(g + 1) * H])
        whh = whh.at[H:H2, g * GP + H:g * GP + H2].set(wb[:, g * H:(g + 1) * H])

    fmask = jnp.zeros((1, GW), f32)
    for g in range(3):
        fmask = fmask.at[:, g * GP:g * GP + H].set(1.0)

    # --- pack everything into two slabs (3 input DMAs total) ---
    VB = _round_up(D + H2, 8)
    slab_g = jnp.zeros((VB + 16, GW), f32)                            # gate-width slab
    slab_g = slab_g.at[0:D, :].set(wih)
    slab_g = slab_g.at[D:D + H2, :].set(whh)
    slab_g = slab_g.at[VB:VB + 1, :].set(bih)
    slab_g = slab_g.at[VB + 1:VB + 2, :].set(fmask)
    slab_g = slab_g.at[VB + 8:VB + 16, :].set(jnp.tile(bhh, (PB, 1)))

    CB = _round_up(3 * Cin + D, 8)
    slab_c = jnp.zeros((CB + 8, D), f32)                              # channel-width slab
    slab_c = slab_c.at[0:3 * Cin, :].set(wc)
    slab_c = slab_c.at[3 * Cin:3 * Cin + D, :].set(p["lin_w"].T)
    slab_c = slab_c.at[CB:CB + 1, :].set(bn_bias[None, :])
    slab_c = slab_c.at[CB + 1:CB + 2, :].set(p["lin_b"][None, :])

    # --- im2col, batch zero-padded to PB sublanes, time-major rows (t*PB + b) ---
    x_pb = jnp.zeros((PB, T, Cin), f32).at[0:B].set(x.astype(f32))
    x_pad = jnp.pad(x_pb, ((0, 0), (1, 1), (0, 0)))                   # (PB, T+2, Cin)
    x3 = jnp.concatenate([x_pad[:, k:k + T, :] for k in range(3)], axis=-1)
    x3_tm = jnp.transpose(x3, (1, 0, 2)).reshape(T * PB, 3 * Cin)     # (T*PB, 3*Cin)

    kernel = _make_kernel(T, Cin, D, H)
    # Whole problem (~200 KiB) fits in VMEM: no grid / tiling / pipelining.
    out = pl.pallas_call(
        kernel,
        out_shape=jax.ShapeDtypeStruct((PB, D), f32),
        in_specs=[pl.BlockSpec(memory_space=pltpu.MemorySpace.VMEM)] * 3,
        out_specs=pl.BlockSpec(memory_space=pltpu.MemorySpace.VMEM),
    )(x3_tm, slab_g, slab_c)
    return out[:B].reshape(B, 1, D)


# --------------------------- pure-JAX reference --------------------------------
def reference_forward(x, p):
    B, T, Cin = x.shape
    D = p["conv_w"].shape[0]
    H = D // 2
    eps = 1e-5

    x_ncw = jnp.transpose(x, (0, 2, 1))                       # (B, Cin, T)
    feat = lax.conv_general_dilated(
        x_ncw, p["conv_w"], window_strides=(1,), padding=[(1, 1)],
        dimension_numbers=("NCH", "OIH", "NCH"))
    scale = p["bn_gamma"] / jnp.sqrt(p["bn_var"] + eps)
    bias = p["bn_beta"] - p["bn_mean"] * scale
    feat = jnp.maximum(feat * scale[None, :, None] + bias[None, :, None], 0.0)
    feat = jnp.transpose(feat, (0, 2, 1))                     # (B, T, D)

    def gru_dir(w_ih, w_hh, b_ih, b_hh, seq):
        def step(h, x_t):
            gi = x_t @ w_ih.T + b_ih
            gh = h @ w_hh.T + b_hh
            r = jax.nn.sigmoid(gi[:, :H] + gh[:, :H])
            z = jax.nn.sigmoid(gi[:, H:2 * H] + gh[:, H:2 * H])
            n = jnp.tanh(gi[:, 2 * H:] + r * gh[:, 2 * H:])
            return (1.0 - z) * n + z * h, None
        h0 = jnp.zeros((B, H), jnp.float32)
        h_final, _ = lax.scan(step, h0, jnp.transpose(seq, (1, 0, 2)))
        return h_final

    h_f = gru_dir(p["w_ih_f"], p["w_hh_f"], p["b_ih_f"], p["b_hh_f"], feat)
    h_b = gru_dir(p["w_ih_b"], p["w_hh_b"], p["b_ih_b"], p["b_hh_b"], feat[:, ::-1])
    y = jnp.concatenate([h_f, h_b], axis=-1)

    y = jnp.tanh(y @ p["lin_w"].T + p["lin_b"])
    y = jnp.clip(y, -2.0, 2.0)
    n = jnp.sqrt(jnp.sum(y * y, axis=-1, keepdims=True))
    ns = jnp.clip(n, 1e-8, 5.0)
    y = y / ns * jnp.minimum(ns, 1.0)
    return y.reshape(B, 1, D)


# ------------------------------ params ------------------------------------------
def init_params(key, enc_dim, tok_dim):
    D, Cin, H = tok_dim, enc_dim, tok_dim // 2
    ks = jax.random.split(key, 16)

    def u(k, shape, s):
        return jax.random.uniform(k, shape, jnp.float32, -s, s)

    sc = 1.0 / (Cin * 3) ** 0.5
    sg = 1.0 / H ** 0.5
    sl = 1.0 / D ** 0.5
    return {
        "conv_w":  u(ks[0], (D, Cin, 3), sc),                       # PyTorch (Cout,Cin,K)
        "bn_gamma": 1.0 + 0.1 * jax.random.normal(ks[1], (D,), jnp.float32),
        "bn_beta":  0.1 * jax.random.normal(ks[2], (D,), jnp.float32),
        "bn_mean":  0.1 * jax.random.normal(ks[3], (D,), jnp.float32),
        "bn_var":   jnp.abs(jax.random.normal(ks[4], (D,), jnp.float32)) + 0.5,
        "w_ih_f": u(ks[5], (3 * H, D), sg), "w_hh_f": u(ks[6], (3 * H, H), sg),
        "b_ih_f": u(ks[7], (3 * H,), sg),   "b_hh_f": u(ks[8], (3 * H,), sg),
        "w_ih_b": u(ks[9], (3 * H, D), sg), "w_hh_b": u(ks[10], (3 * H, H), sg),
        "b_ih_b": u(ks[11], (3 * H,), sg),  "b_hh_b": u(ks[12], (3 * H,), sg),
        "lin_w": u(ks[13], (D, D), sl),     "lin_b": u(ks[14], (D,), sl),
    }


if __name__ == "__main__":
    B, T = 2, 8
    enc_dim = 32   # hparams.encoder_embedding_dim
    tok_dim = 32   # hparams.token_embedding_size

    key = jax.random.PRNGKey(0)
    kx, kp = jax.random.split(key)
    x = jax.random.normal(kx, (B, T, enc_dim), jnp.float32)
    params = init_params(kp, enc_dim, tok_dim)

    out = jax.block_until_ready(tpse_gst_forward(x, params))
    ref = jax.block_until_ready(reference_forward(x, params))
    if out.shape != (B, 1, tok_dim) or not bool(
            jnp.allclose(out, ref, atol=2e-3, rtol=2e-3)):
        raise SystemExit(
            f"MISMATCH: shape={out.shape} max_err={float(jnp.max(jnp.abs(out - ref)))}")

    print("KERNEL_OK")
</pallas_src>

<mosaic_0001>
module attributes {stable_mosaic.version = 11 : i64} {
  func.func @kernel(%arg0: memref<64x96xf32, #tpu.memory_space<vmem>>, %arg1: memref<80x384xf32, #tpu.memory_space<vmem>>, %arg2: memref<136x32xf32, #tpu.memory_space<vmem>>, %arg3: memref<8x32xf32, #tpu.memory_space<vmem>>) attributes {dimension_semantics = [], scalar_prefetch = 0 : i64, scratch_operands = 0 : i64, tpu.core_type = #tpu.core_type<tc>} {
    %c0 = arith.constant 0 : index
    %c0_0 = arith.constant 0 : index
    %0 = vector.load %arg1[%c0, %c0_0] : memref<80x384xf32, #tpu.memory_space<vmem>>, vector<32x384xf32>
    %c32 = arith.constant 32 : index
    %c0_1 = arith.constant 0 : index
    %1 = vector.load %arg1[%c32, %c0_1] : memref<80x384xf32, #tpu.memory_space<vmem>>, vector<32x384xf32>
    %c64 = arith.constant 64 : index
    %c0_2 = arith.constant 0 : index
    %2 = vector.load %arg1[%c64, %c0_2] : memref<80x384xf32, #tpu.memory_space<vmem>>, vector<1x384xf32>
    %c65 = arith.constant 65 : index
    %c0_3 = arith.constant 0 : index
    %3 = vector.load %arg1[%c65, %c0_3] : memref<80x384xf32, #tpu.memory_space<vmem>>, vector<1x384xf32>
    %cst = arith.constant 5.000000e-01 : f32
    %4 = vector.broadcast %cst : f32 to vector<1x384xf32>
    %5 = arith.cmpf ogt, %3, %4 : vector<1x384xf32>
    %c72 = arith.constant 72 : index
    %c0_4 = arith.constant 0 : index
    %6 = vector.load %arg1[%c72, %c0_4] : memref<80x384xf32, #tpu.memory_space<vmem>>, vector<8x384xf32>
    %c0_5 = arith.constant 0 : index
    %c0_6 = arith.constant 0 : index
    %7 = vector.load %arg2[%c0_5, %c0_6] : memref<136x32xf32, #tpu.memory_space<vmem>>, vector<96x32xf32>
    %c96 = arith.constant 96 : index
    %c0_7 = arith.constant 0 : index
    %8 = vector.load %arg2[%c96, %c0_7] : memref<136x32xf32, #tpu.memory_space<vmem>>, vector<32x32xf32>
    %c128 = arith.constant 128 : index
    %c0_8 = arith.constant 0 : index
    %9 = vector.load %arg2[%c128, %c0_8] : memref<136x32xf32, #tpu.memory_space<vmem>>, vector<1x32xf32>
    %c129 = arith.constant 129 : index
    %c0_9 = arith.constant 0 : index
    %10 = vector.load %arg2[%c129, %c0_9] : memref<136x32xf32, #tpu.memory_space<vmem>>, vector<1x32xf32>
    %c0_10 = arith.constant 0 : index
    %c0_11 = arith.constant 0 : index
    %11 = vector.load %arg0[%c0_10, %c0_11] : memref<64x96xf32, #tpu.memory_space<vmem>>, vector<64x96xf32>
    %cst_12 = arith.constant dense<0.000000e+00> : vector<64x32xf32>
    %12 = tpu.matmul %11, %7, %cst_12 {dimension_numbers = #tpu.dot_dimension_numbers<[1], [0], [0], [1], [0, 0, 1, 1], [], []>} : vector<64x96xf32>, vector<96x32xf32>, vector<64x32xf32> -> vector<64x32xf32>
    %13 = vector.broadcast %9 : vector<1x32xf32> to vector<64x32xf32>
    %14 = arith.addf %12, %13 : vector<64x32xf32>
    %cst_13 = arith.constant 0.000000e+00 : f32
    %15 = vector.broadcast %cst_13 : f32 to vector<64x32xf32>
    %16 = arith.maximumf %14, %15 : vector<64x32xf32>
    %cst_14 = arith.constant dense<0.000000e+00> : vector<64x384xf32>
    %17 = tpu.matmul %16, %0, %cst_14 {dimension_numbers = #tpu.dot_dimension_numbers<[1], [0], [0], [1], [0, 0, 1, 1], [], []>} : vector<64x32xf32>, vector<32x384xf32>, vector<64x384xf32> -> vector<64x384xf32>
    %18 = vector.broadcast %2 : vector<1x384xf32> to vector<64x384xf32>
    %19 = arith.addf %17, %18 : vector<64x384xf32>
    %20 = vector.extract_strided_slice %19 {offsets = [0, 0], sizes = [8, 384], strides = [1, 1]} : vector<64x384xf32> to vector<8x384xf32>
    %21 = vector.extract_strided_slice %19 {offsets = [56, 0], sizes = [8, 384], strides = [1, 1]} : vector<64x384xf32> to vector<8x384xf32>
    %22 = vector.shape_cast %5 : vector<1x384xi1> to vector<1x384xi1>
    %23 = vector.broadcast %22 : vector<1x384xi1> to vector<8x384xi1>
    %24 = arith.select %23, %20, %21 : vector<8x384xi1>, vector<8x384xf32>
    %25 = vector.extract_strided_slice %19 {offsets = [8, 0], sizes = [8, 384], strides = [1, 1]} : vector<64x384xf32> to vector<8x384xf32>
    %26 = vector.extract_strided_slice %19 {offsets = [48, 0], sizes = [8, 384], strides = [1, 1]} : vector<64x384xf32> to vector<8x384xf32>
    %27 = vector.shape_cast %5 : vector<1x384xi1> to vector<1x384xi1>
    %28 = vector.broadcast %27 : vector<1x384xi1> to vector<8x384xi1>
    %29 = arith.select %28, %25, %26 : vector<8x384xi1>, vector<8x384xf32>
    %30 = vector.extract_strided_slice %19 {offsets = [16, 0], sizes = [8, 384], strides = [1, 1]} : vector<64x384xf32> to vector<8x384xf32>
    %31 = vector.extract_strided_slice %19 {offsets = [40, 0], sizes = [8, 384], strides = [1, 1]} : vector<64x384xf32> to vector<8x384xf32>
    %32 = vector.shape_cast %5 : vector<1x384xi1> to vector<1x384xi1>
    %33 = vector.broadcast %32 : vector<1x384xi1> to vector<8x384xi1>
    %34 = arith.select %33, %30, %31 : vector<8x384xi1>, vector<8x384xf32>
    %35 = vector.extract_strided_slice %19 {offsets = [24, 0], sizes = [8, 384], strides = [1, 1]} : vector<64x384xf32> to vector<8x384xf32>
    %36 = vector.extract_strided_slice %19 {offsets = [32, 0], sizes = [8, 384], strides = [1, 1]} : vector<64x384xf32> to vector<8x384xf32>
    %37 = vector.shape_cast %5 : vector<1x384xi1> to vector<1x384xi1>
    %38 = vector.broadcast %37 : vector<1x384xi1> to vector<8x384xi1>
    %39 = arith.select %38, %35, %36 : vector<8x384xi1>, vector<8x384xf32>
    %40 = vector.extract_strided_slice %19 {offsets = [32, 0], sizes = [8, 384], strides = [1, 1]} : vector<64x384xf32> to vector<8x384xf32>
    %41 = vector.extract_strided_slice %19 {offsets = [24, 0], sizes = [8, 384], strides = [1, 1]} : vector<64x384xf32> to vector<8x384xf32>
    %42 = vector.shape_cast %5 : vector<1x384xi1> to vector<1x384xi1>
    %43 = vector.broadcast %42 : vector<1x384xi1> to vector<8x384xi1>
    %44 = arith.select %43, %40, %41 : vector<8x384xi1>, vector<8x384xf32>
    %45 = vector.extract_strided_slice %19 {offsets = [40, 0], sizes = [8, 384], strides = [1, 1]} : vector<64x384xf32> to vector<8x384xf32>
    %46 = vector.extract_strided_slice %19 {offsets = [16, 0], sizes = [8, 384], strides = [1, 1]} : vector<64x384xf32> to vector<8x384xf32>
    %47 = vector.shape_cast %5 : vector<1x384xi1> to vector<1x384xi1>
    %48 = vector.broadcast %47 : vector<1x384xi1> to vector<8x384xi1>
    %49 = arith.select %48, %45, %46 : vector<8x384xi1>, vector<8x384xf32>
    %50 = vector.extract_strided_slice %19 {offsets = [48, 0], sizes = [8, 384], strides = [1, 1]} : vector<64x384xf32> to vector<8x384xf32>
    %51 = vector.extract_strided_slice %19 {offsets = [8, 0], sizes = [8, 384], strides = [1, 1]} : vector<64x384xf32> to vector<8x384xf32>
    %52 = vector.shape_cast %5 : vector<1x384xi1> to vector<1x384xi1>
    %53 = vector.broadcast %52 : vector<1x384xi1> to vector<8x384xi1>
    %54 = arith.select %53, %50, %51 : vector<8x384xi1>, vector<8x384xf32>
    %55 = vector.extract_strided_slice %19 {offsets = [56, 0], sizes = [8, 384], strides = [1, 1]} : vector<64x384xf32> to vector<8x384xf32>
    %56 = vector.extract_strided_slice %19 {offsets = [0, 0], sizes = [8, 384], strides = [1, 1]} : vector<64x384xf32> to vector<8x384xf32>
    %57 = vector.shape_cast %5 : vector<1x384xi1> to vector<1x384xi1>
    %58 = vector.broadcast %57 : vector<1x384xi1> to vector<8x384xi1>
    %59 = arith.select %58, %55, %56 : vector<8x384xi1>, vector<8x384xf32>
    %cst_15 = arith.constant 0.000000e+00 : f32
    %60 = vector.broadcast %cst_15 : f32 to vector<8x32xf32>
    %cst_16 = arith.constant dense<0.000000e+00> : vector<8x384xf32>
    %61 = tpu.matmul %60, %1, %cst_16 {dimension_numbers = #tpu.dot_dimension_numbers<[1], [0], [0], [1], [0, 0, 1, 1], [], []>} : vector<8x32xf32>, vector<32x384xf32>, vector<8x384xf32> -> vector<8x384xf32>
    %62 = arith.addf %61, %6 : vector<8x384xf32>
    %63 = vector.extract_strided_slice %24 {offsets = [0, 0], sizes = [8, 256], strides = [1, 1]} : vector<8x384xf32> to vector<8x256xf32>
    %64 = vector.extract_strided_slice %62 {offsets = [0, 0], sizes = [8, 256], strides = [1, 1]} : vector<8x384xf32> to vector<8x256xf32>
    %65 = arith.addf %63, %64 : vector<8x256xf32>
    %66 = arith.negf %65 : vector<8x256xf32>
    %67 = math.exp %66 : vector<8x256xf32>
    %cst_17 = arith.constant 1.000000e+00 : f32
    %68 = vector.broadcast %cst_17 : f32 to vector<8x256xf32>
    %69 = arith.addf %68, %67 : vector<8x256xf32>
    %70 = arith.divf %68, %69 : vector<8x256xf32>
    %71 = vector.extract_strided_slice %24 {offsets = [0, 256], sizes = [8, 128], strides = [1, 1]} : vector<8x384xf32> to vector<8x128xf32>
    %72 = vector.extract_strided_slice %70 {offsets = [0, 0], sizes = [8, 128], strides = [1, 1]} : vector<8x256xf32> to vector<8x128xf32>
    %73 = vector.extract_strided_slice %62 {offsets = [0, 256], sizes = [8, 128], strides = [1, 1]} : vector<8x384xf32> to vector<8x128xf32>
    %74 = arith.mulf %72, %73 : vector<8x128xf32>
    %75 = arith.addf %71, %74 : vector<8x128xf32>
    %76 = math.tanh %75 : vector<8x128xf32>
    %77 = vector.extract_strided_slice %70 {offsets = [0, 128], sizes = [8, 32], strides = [1, 1]} : vector<8x256xf32> to vector<8x32xf32>
    %cst_18 = arith.constant 1.000000e+00 : f32
    %78 = vector.broadcast %cst_18 : f32 to vector<8x32xf32>
    %79 = arith.subf %78, %77 : vector<8x32xf32>
    %80 = vector.extract_strided_slice %76 {offsets = [0, 0], sizes = [8, 32], strides = [1, 1]} : vector<8x128xf32> to vector<8x32xf32>
    %81 = arith.mulf %79, %80 : vector<8x32xf32>
    %82 = arith.mulf %77, %60 : vector<8x32xf32>
    %83 = arith.addf %81, %82 : vector<8x32xf32>
    %cst_19 = arith.constant dense<0.000000e+00> : vector<8x384xf32>
    %84 = tpu.matmul %83, %1, %cst_19 {dimension_numbers = #tpu.dot_dimension_numbers<[1], [0], [0], [1], [0, 0, 1, 1], [], []>} : vector<8x32xf32>, vector<32x384xf32>, vector<8x384xf32> -> vector<8x384xf32>
    %85 = arith.addf %84, %6 : vector<8x384xf32>
    %86 = vector.extract_strided_slice %29 {offsets = [0, 0], sizes = [8, 256], strides = [1, 1]} : vector<8x384xf32> to vector<8x256xf32>
    %87 = vector.extract_strided_slice %85 {offsets = [0, 0], sizes = [8, 256], strides = [1, 1]} : vector<8x384xf32> to vector<8x256xf32>
    %88 = arith.addf %86, %87 : vector<8x256xf32>
    %89 = arith.negf %88 : vector<8x256xf32>
    %90 = math.exp %89 : vector<8x256xf32>
    %cst_20 = arith.constant 1.000000e+00 : f32
    %91 = vector.broadcast %cst_20 : f32 to vector<8x256xf32>
    %92 = arith.addf %91, %90 : vector<8x256xf32>
    %93 = arith.divf %91, %92 : vector<8x256xf32>
    %94 = vector.extract_strided_slice %29 {offsets = [0, 256], sizes = [8, 128], strides = [1, 1]} : vector<8x384xf32> to vector<8x128xf32>
    %95 = vector.extract_strided_slice %93 {offsets = [0, 0], sizes = [8, 128], strides = [1, 1]} : vector<8x256xf32> to vector<8x128xf32>
    %96 = vector.extract_strided_slice %85 {offsets = [0, 256], sizes = [8, 128], strides = [1, 1]} : vector<8x384xf32> to vector<8x128xf32>
    %97 = arith.mulf %95, %96 : vector<8x128xf32>
    %98 = arith.addf %94, %97 : vector<8x128xf32>
    %99 = math.tanh %98 : vector<8x128xf32>
    %100 = vector.extract_strided_slice %93 {offsets = [0, 128], sizes = [8, 32], strides = [1, 1]} : vector<8x256xf32> to vector<8x32xf32>
    %cst_21 = arith.constant 1.000000e+00 : f32
    %101 = vector.broadcast %cst_21 : f32 to vector<8x32xf32>
    %102 = arith.subf %101, %100 : vector<8x32xf32>
    %103 = vector.extract_strided_slice %99 {offsets = [0, 0], sizes = [8, 32], strides = [1, 1]} : vector<8x128xf32> to vector<8x32xf32>
    %104 = arith.mulf %102, %103 : vector<8x32xf32>
    %105 = arith.mulf %100, %83 : vector<8x32xf32>
    %106 = arith.addf %104, %105 : vector<8x32xf32>
    %cst_22 = arith.constant dense<0.000000e+00> : vector<8x384xf32>
    %107 = tpu.matmul %106, %1, %cst_22 {dimension_numbers = #tpu.dot_dimension_numbers<[1], [0], [0], [1], [0, 0, 1, 1], [], []>} : vector<8x32xf32>, vector<32x384xf32>, vector<8x384xf32> -> vector<8x384xf32>
    %108 = arith.addf %107, %6 : vector<8x384xf32>
    %109 = vector.extract_strided_slice %34 {offsets = [0, 0], sizes = [8, 256], strides = [1, 1]} : vector<8x384xf32> to vector<8x256xf32>
    %110 = vector.extract_strided_slice %108 {offsets = [0, 0], sizes = [8, 256], strides = [1, 1]} : vector<8x384xf32> to vector<8x256xf32>
    %111 = arith.addf %109, %110 : vector<8x256xf32>
    %112 = arith.negf %111 : vector<8x256xf32>
    %113 = math.exp %112 : vector<8x256xf32>
    %cst_23 = arith.constant 1.000000e+00 : f32
    %114 = vector.broadcast %cst_23 : f32 to vector<8x256xf32>
    %115 = arith.addf %114, %113 : vector<8x256xf32>
    %116 = arith.divf %114, %115 : vector<8x256xf32>
    %117 = vector.extract_strided_slice %34 {offsets = [0, 256], sizes = [8, 128], strides = [1, 1]} : vector<8x384xf32> to vector<8x128xf32>
    %118 = vector.extract_strided_slice %116 {offsets = [0, 0], sizes = [8, 128], strides = [1, 1]} : vector<8x256xf32> to vector<8x128xf32>
    %119 = vector.extract_strided_slice %108 {offsets = [0, 256], sizes = [8, 128], strides = [1, 1]} : vector<8x384xf32> to vector<8x128xf32>
    %120 = arith.mulf %118, %119 : vector<8x128xf32>
    %121 = arith.addf %117, %120 : vector<8x128xf32>
    %122 = math.tanh %121 : vector<8x128xf32>
    %123 = vector.extract_strided_slice %116 {offsets = [0, 128], sizes = [8, 32], strides = [1, 1]} : vector<8x256xf32> to vector<8x32xf32>
    %cst_24 = arith.constant 1.000000e+00 : f32
    %124 = vector.broadcast %cst_24 : f32 to vector<8x32xf32>
    %125 = arith.subf %124, %123 : vector<8x32xf32>
    %126 = vector.extract_strided_slice %122 {offsets = [0, 0], sizes = [8, 32], strides = [1, 1]} : vector<8x128xf32> to vector<8x32xf32>
    %127 = arith.mulf %125, %126 : vector<8x32xf32>
    %128 = arith.mulf %123, %106 : vector<8x32xf32>
    %129 = arith.addf %127, %128 : vector<8x32xf32>
    %cst_25 = arith.constant dense<0.000000e+00> : vector<8x384xf32>
    %130 = tpu.matmul %129, %1, %cst_25 {dimension_numbers = #tpu.dot_dimension_numbers<[1], [0], [0], [1], [0, 0, 1, 1], [], []>} : vector<8x32xf32>, vector<32x384xf32>, vector<8x384xf32> -> vector<8x384xf32>
    %131 = arith.addf %130, %6 : vector<8x384xf32>
    %132 = vector.extract_strided_slice %39 {offsets = [0, 0], sizes = [8, 256], strides = [1, 1]} : vector<8x384xf32> to vector<8x256xf32>
    %133 = vector.extract_strided_slice %131 {offsets = [0, 0], sizes = [8, 256], strides = [1, 1]} : vector<8x384xf32> to vector<8x256xf32>
    %134 = arith.addf %132, %133 : vector<8x256xf32>
    %135 = arith.negf %134 : vector<8x256xf32>
    %136 = math.exp %135 : vector<8x256xf32>
    %cst_26 = arith.constant 1.000000e+00 : f32
    %137 = vector.broadcast %cst_26 : f32 to vector<8x256xf32>
    %138 = arith.addf %137, %136 : vector<8x256xf32>
    %139 = arith.divf %137, %138 : vector<8x256xf32>
    %140 = vector.extract_strided_slice %39 {offsets = [0, 256], sizes = [8, 128], strides = [1, 1]} : vector<8x384xf32> to vector<8x128xf32>
    %141 = vector.extract_strided_slice %139 {offsets = [0, 0], sizes = [8, 128], strides = [1, 1]} : vector<8x256xf32> to vector<8x128xf32>
    %142 = vector.extract_strided_slice %131 {offsets = [0, 256], sizes = [8, 128], strides = [1, 1]} : vector<8x384xf32> to vector<8x128xf32>
    %143 = arith.mulf %141, %142 : vector<8x128xf32>
    %144 = arith.addf %140, %143 : vector<8x128xf32>
    %145 = math.tanh %144 : vector<8x128xf32>
    %146 = vector.extract_strided_slice %139 {offsets = [0, 128], sizes = [8, 32], strides = [1, 1]} : vector<8x256xf32> to vector<8x32xf32>
    %cst_27 = arith.constant 1.000000e+00 : f32
    %147 = vector.broadcast %cst_27 : f32 to vector<8x32xf32>
    %148 = arith.subf %147, %146 : vector<8x32xf32>
    %149 = vector.extract_strided_slice %145 {offsets = [0, 0], sizes = [8, 32], strides = [1, 1]} : vector<8x128xf32> to vector<8x32xf32>
    %150 = arith.mulf %148, %149 : vector<8x32xf32>
    %151 = arith.mulf %146, %129 : vector<8x32xf32>
    %152 = arith.addf %150, %151 : vector<8x32xf32>
    %cst_28 = arith.constant dense<0.000000e+00> : vector<8x384xf32>
    %153 = tpu.matmul %152, %1, %cst_28 {dimension_numbers = #tpu.dot_dimension_numbers<[1], [0], [0], [1], [0, 0, 1, 1], [], []>} : vector<8x32xf32>, vector<32x384xf32>, vector<8x384xf32> -> vector<8x384xf32>
    %154 = arith.addf %153, %6 : vector<8x384xf32>
    %155 = vector.extract_strided_slice %44 {offsets = [0, 0], sizes = [8, 256], strides = [1, 1]} : vector<8x384xf32> to vector<8x256xf32>
    %156 = vector.extract_strided_slice %154 {offsets = [0, 0], sizes = [8, 256], strides = [1, 1]} : vector<8x384xf32> to vector<8x256xf32>
    %157 = arith.addf %155, %156 : vector<8x256xf32>
    %158 = arith.negf %157 : vector<8x256xf32>
    %159 = math.exp %158 : vector<8x256xf32>
    %cst_29 = arith.constant 1.000000e+00 : f32
    %160 = vector.broadcast %cst_29 : f32 to vector<8x256xf32>
    %161 = arith.addf %160, %159 : vector<8x256xf32>
    %162 = arith.divf %160, %161 : vector<8x256xf32>
    %163 = vector.extract_strided_slice %44 {offsets = [0, 256], sizes = [8, 128], strides = [1, 1]} : vector<8x384xf32> to vector<8x128xf32>
    %164 = vector.extract_strided_slice %162 {offsets = [0, 0], sizes = [8, 128], strides = [1, 1]} : vector<8x256xf32> to vector<8x128xf32>
    %165 = vector.extract_strided_slice %154 {offsets = [0, 256], sizes = [8, 128], strides = [1, 1]} : vector<8x384xf32> to vector<8x128xf32>
    %166 = arith.mulf %164, %165 : vector<8x128xf32>
    %167 = arith.addf %163, %166 : vector<8x128xf32>
    %168 = math.tanh %167 : vector<8x128xf32>
    %169 = vector.extract_strided_slice %162 {offsets = [0, 128], sizes = [8, 32], strides = [1, 1]} : vector<8x256xf32> to vector<8x32xf32>
    %cst_30 = arith.constant 1.000000e+00 : f32
    %170 = vector.broadcast %cst_30 : f32 to vector<8x32xf32>
    %171 = arith.subf %170, %169 : vector<8x32xf32>
    %172 = vector.extract_strided_slice %168 {offsets = [0, 0], sizes = [8, 32], strides = [1, 1]} : vector<8x128xf32> to vector<8x32xf32>
    %173 = arith.mulf %171, %172 : vector<8x32xf32>
    %174 = arith.mulf %169, %152 : vector<8x32xf32>
    %175 = arith.addf %173, %174 : vector<8x32xf32>
    %cst_31 = arith.constant dense<0.000000e+00> : vector<8x384xf32>
    %176 = tpu.matmul %175, %1, %cst_31 {dimension_numbers = #tpu.dot_dimension_numbers<[1], [0], [0], [1], [0, 0, 1, 1], [], []>} : vector<8x32xf32>, vector<32x384xf32>, vector<8x384xf32> -> vector<8x384xf32>
    %177 = arith.addf %176, %6 : vector<8x384xf32>
    %178 = vector.extract_strided_slice %49 {offsets = [0, 0], sizes = [8, 256], strides = [1, 1]} : vector<8x384xf32> to vector<8x256xf32>
    %179 = vector.extract_strided_slice %177 {offsets = [0, 0], sizes = [8, 256], strides = [1, 1]} : vector<8x384xf32> to vector<8x256xf32>
    %180 = arith.addf %178, %179 : vector<8x256xf32>
    %181 = arith.negf %180 : vector<8x256xf32>
    %182 = math.exp %181 : vector<8x256xf32>
    %cst_32 = arith.constant 1.000000e+00 : f32
    %183 = vector.broadcast %cst_32 : f32 to vector<8x256xf32>
    %184 = arith.addf %183, %182 : vector<8x256xf32>
    %185 = arith.divf %183, %184 : vector<8x256xf32>
    %186 = vector.extract_strided_slice %49 {offsets = [0, 256], sizes = [8, 128], strides = [1, 1]} : vector<8x384xf32> to vector<8x128xf32>
    %187 = vector.extract_strided_slice %185 {offsets = [0, 0], sizes = [8, 128], strides = [1, 1]} : vector<8x256xf32> to vector<8x128xf32>
    %188 = vector.extract_strided_slice %177 {offsets = [0, 256], sizes = [8, 128], strides = [1, 1]} : vector<8x384xf32> to vector<8x128xf32>
    %189 = arith.mulf %187, %188 : vector<8x128xf32>
    %190 = arith.addf %186, %189 : vector<8x128xf32>
    %191 = math.tanh %190 : vector<8x128xf32>
    %192 = vector.extract_strided_slice %185 {offsets = [0, 128], sizes = [8, 32], strides = [1, 1]} : vector<8x256xf32> to vector<8x32xf32>
    %cst_33 = arith.constant 1.000000e+00 : f32
    %193 = vector.broadcast %cst_33 : f32 to vector<8x32xf32>
    %194 = arith.subf %193, %192 : vector<8x32xf32>
    %195 = vector.extract_strided_slice %191 {offsets = [0, 0], sizes = [8, 32], strides = [1, 1]} : vector<8x128xf32> to vector<8x32xf32>
    %196 = arith.mulf %194, %195 : vector<8x32xf32>
    %197 = arith.mulf %192, %175 : vector<8x32xf32>
    %198 = arith.addf %196, %197 : vector<8x32xf32>
    %cst_34 = arith.constant dense<0.000000e+00> : vector<8x384xf32>
    %199 = tpu.matmul %198, %1, %cst_34 {dimension_numbers = #tpu.dot_dimension_numbers<[1], [0], [0], [1], [0, 0, 1, 1], [], []>} : vector<8x32xf32>, vector<32x384xf32>, vector<8x384xf32> -> vector<8x384xf32>
    %200 = arith.addf %199, %6 : vector<8x384xf32>
    %201 = vector.extract_strided_slice %54 {offsets = [0, 0], sizes = [8, 256], strides = [1, 1]} : vector<8x384xf32> to vector<8x256xf32>
    %202 = vector.extract_strided_slice %200 {offsets = [0, 0], sizes = [8, 256], strides = [1, 1]} : vector<8x384xf32> to vector<8x256xf32>
    %203 = arith.addf %201, %202 : vector<8x256xf32>
    %204 = arith.negf %203 : vector<8x256xf32>
    %205 = math.exp %204 : vector<8x256xf32>
    %cst_35 = arith.constant 1.000000e+00 : f32
    %206 = vector.broadcast %cst_35 : f32 to vector<8x256xf32>
    %207 = arith.addf %206, %205 : vector<8x256xf32>
    %208 = arith.divf %206, %207 : vector<8x256xf32>
    %209 = vector.extract_strided_slice %54 {offsets = [0, 256], sizes = [8, 128], strides = [1, 1]} : vector<8x384xf32> to vector<8x128xf32>
    %210 = vector.extract_strided_slice %208 {offsets = [0, 0], sizes = [8, 128], strides = [1, 1]} : vector<8x256xf32> to vector<8x128xf32>
    %211 = vector.extract_strided_slice %200 {offsets = [0, 256], sizes = [8, 128], strides = [1, 1]} : vector<8x384xf32> to vector<8x128xf32>
    %212 = arith.mulf %210, %211 : vector<8x128xf32>
    %213 = arith.addf %209, %212 : vector<8x128xf32>
    %214 = math.tanh %213 : vector<8x128xf32>
    %215 = vector.extract_strided_slice %208 {offsets = [0, 128], sizes = [8, 32], strides = [1, 1]} : vector<8x256xf32> to vector<8x32xf32>
    %cst_36 = arith.constant 1.000000e+00 : f32
    %216 = vector.broadcast %cst_36 : f32 to vector<8x32xf32>
    %217 = arith.subf %216, %215 : vector<8x32xf32>
    %218 = vector.extract_strided_slice %214 {offsets = [0, 0], sizes = [8, 32], strides = [1, 1]} : vector<8x128xf32> to vector<8x32xf32>
    %219 = arith.mulf %217, %218 : vector<8x32xf32>
    %220 = arith.mulf %215, %198 : vector<8x32xf32>
    %221 = arith.addf %219, %220 : vector<8x32xf32>
    %cst_37 = arith.constant dense<0.000000e+00> : vector<8x384xf32>
    %222 = tpu.matmul %221, %1, %cst_37 {dimension_numbers = #tpu.dot_dimension_numbers<[1], [0], [0], [1], [0, 0, 1, 1], [], []>} : vector<8x32xf32>, vector<32x384xf32>, vector<8x384xf32> -> vector<8x384xf32>
    %223 = arith.addf %222, %6 : vector<8x384xf32>
    %224 = vector.extract_strided_slice %59 {offsets = [0, 0], sizes = [8, 256], strides = [1, 1]} : vector<8x384xf32> to vector<8x256xf32>
    %225 = vector.extract_strided_slice %223 {offsets = [0, 0], sizes = [8, 256], strides = [1, 1]} : vector<8x384xf32> to vector<8x256xf32>
    %226 = arith.addf %224, %225 : vector<8x256xf32>
    %227 = arith.negf %226 : vector<8x256xf32>
    %228 = math.exp %227 : vector<8x256xf32>
    %cst_38 = arith.constant 1.000000e+00 : f32
    %229 = vector.broadcast %cst_38 : f32 to vector<8x256xf32>
    %230 = arith.addf %229, %228 : vector<8x256xf32>
    %231 = arith.divf %229, %230 : vector<8x256xf32>
    %232 = vector.extract_strided_slice %59 {offsets = [0, 256], sizes = [8, 128], strides = [1, 1]} : vector<8x384xf32> to vector<8x128xf32>
    %233 = vector.extract_strided_slice %231 {offsets = [0, 0], sizes = [8, 128], strides = [1, 1]} : vector<8x256xf32> to vector<8x128xf32>
    %234 = vector.extract_strided_slice %223 {offsets = [0, 256], sizes = [8, 128], strides = [1, 1]} : vector<8x384xf32> to vector<8x128xf32>
    %235 = arith.mulf %233, %234 : vector<8x128xf32>
    %236 = arith.addf %232, %235 : vector<8x128xf32>
    %237 = math.tanh %236 : vector<8x128xf32>
    %238 = vector.extract_strided_slice %231 {offsets = [0, 128], sizes = [8, 32], strides = [1, 1]} : vector<8x256xf32> to vector<8x32xf32>
    %cst_39 = arith.constant 1.000000e+00 : f32
    %239 = vector.broadcast %cst_39 : f32 to vector<8x32xf32>
    %240 = arith.subf %239, %238 : vector<8x32xf32>
    %241 = vector.extract_strided_slice %237 {offsets = [0, 0], sizes = [8, 32], strides = [1, 1]} : vector<8x128xf32> to vector<8x32xf32>
    %242 = arith.mulf %240, %241 : vector<8x32xf32>
    %243 = arith.mulf %238, %221 : vector<8x32xf32>
    %244 = arith.addf %242, %243 : vector<8x32xf32>
    %cst_40 = arith.constant dense<0.000000e+00> : vector<8x32xf32>
    %245 = tpu.matmul %244, %8, %cst_40 {dimension_numbers = #tpu.dot_dimension_numbers<[1], [0], [0], [1], [0, 0, 1, 1], [], []>} : vector<8x32xf32>, vector<32x32xf32>, vector<8x32xf32> -> vector<8x32xf32>
    %246 = vector.broadcast %10 : vector<1x32xf32> to vector<8x32xf32>
    %247 = arith.addf %245, %246 : vector<8x32xf32>
    %248 = math.tanh %247 : vector<8x32xf32>
    %cst_41 = arith.constant -2.000000e+00 : f32
    %cst_42 = arith.constant 2.000000e+00 : f32
    %249 = vector.broadcast %cst_41 : f32 to vector<8x32xf32>
    %250 = arith.maximumf %249, %248 : vector<8x32xf32>
    %251 = vector.broadcast %cst_42 : f32 to vector<8x32xf32>
    %252 = arith.minimumf %251, %250 : vector<8x32xf32>
    %253 = arith.mulf %252, %252 : vector<8x32xf32>
    %cst_43 = arith.constant dense<0.000000e+00> : vector<8xf32>
    %254 = vector.multi_reduction <add>, %253, %cst_43 [1] : vector<8x32xf32> to vector<8xf32>
    %255 = vector.shape_cast %254 : vector<8xf32> to vector<8x1xf32>
    %cst_44 = arith.constant 1.000000e+00 : f32
    %256 = vector.broadcast %cst_44 : f32 to vector<8x1xf32>
    %257 = arith.cmpf ole, %255, %256 : vector<8x1xf32>
    %cst_45 = arith.constant 2.500000e+01 : f32
    %258 = vector.broadcast %cst_45 : f32 to vector<8x1xf32>
    %259 = arith.minimumf %255, %258 : vector<8x1xf32>
    %260 = math.rsqrt %259 : vector<8x1xf32>
    %cst_46 = arith.constant 1.000000e+00 : f32
    %261 = vector.broadcast %cst_46 : f32 to vector<8x1xf32>
    %262 = arith.select %257, %261, %260 : vector<8x1xi1>, vector<8x1xf32>
    %263 = vector.broadcast %262 : vector<8x1xf32> to vector<8x32xf32>
    %264 = arith.mulf %252, %263 : vector<8x32xf32>
    %c0_47 = arith.constant 0 : index
    %c0_48 = arith.constant 0 : index
    %265 = vector.load %arg3[%c0_47, %c0_48] : memref<8x32xf32, #tpu.memory_space<vmem>>, vector<8x32xf32>
    tpu.vector_store %arg3[%c0_47, %c0_48], %264 {strides = array<i32>} : memref<8x32xf32, #tpu.memory_space<vmem>>, vector<8x32xf32>,
    return
  }
}

</mosaic_0001>

<bundles_post_ra>
// kernel: tpu_custom_call.1
= control target key start
LH: loop header
LB: loop body
LE: loop exit
PB: predicated region body
PF: predicated region fallthrough
CT: control target
= control target key end

     0   :  { %8 = vsyncpa [#allocation3], 0  ;;  %s2969_s0 = inlined_call_operand.vmem [shape: f32[64,96], index: 0, kind: input, shape index: {}]   ;;  %s2970_s1 = inlined_call_operand.hbm [shape: f32[80,384], index: 1, kind: input, shape index: {}]   ;;  %s2971_s2 = inlined_call_operand.vmem [shape: f32[136,32], index: 2, kind: input, shape index: {}]   ;;  %s2972_s3 = inlined_call_operand.hbm [shape: f32[8,32], index: 3, kind: output, shape index: {}]  }
   0x1   :  { %9 = vsyncpa [#allocation4], 0  ;;  %s2541_s12 = smov [#allocation2]   ;;  %s2493_s16 = scalar_lea.hbm %s2970_s1, 3840 }
   0x2   :  { %s17_s13 = sshll.u32 %s2541_s12, 4  ;;  %p2494_p0 = scmp.ne.s32.totalorder %s2970_s1, %s2493_s16  ;;  %s18_s13 = int_to_ptr.vmem [resolvable:$true] %s17_s13 }
   0x3   :  { %p2497_p1 = scmp.lt.u32.totalorder %s2493_s16, %s2970_s1 }
   0x5   :  { %p2499_p2 = pnand %p2497_p1, %p2494_p0 }
   0x7   :  { %2502 = shalt.err (!%p2499_p2)
}
   0x8   :  { %s2503_s21 = scalar_lea.vmem %s18_s13, 3840  ;;  %p2508_p4 = scmp.lt.s32.totalorder %s18_s13, %s18_s13 }
   0x9   :  { %p2504_p3 = scmp.ne.s32.totalorder %s18_s13, %s2503_s21  ;;  %p2509_p5 = scmp.lt.s32.totalorder %s2503_s21, %s2503_s21 }
   0xb   :  { %p2510_p6 = por %p2509_p5, %p2508_p4 }
   0xd   :  { %p2511_p7 = pnand %p2510_p6, %p2504_p3 }
   0xf   :  { %2514 = shalt.err (!%p2511_p7)
}
  0x10   :  { %s2542_s22 = smov 384   ;;  %s2543_s23 = smov 24  }
  0x11   :  { %23 = dma.hbm_to_vmem [thread:$0]  %s2970_s1, 3840, %s18_s13, [#allocation3], %s2542_s22, %s2542_s22, %s2543_s23  }
  0x12   :  { %2537 = dma.done.wait [#allocation3], 3840  }
  0x13   :  { %2538 = vsyncadd [#allocation3], 4294963456  ;;  %v61_v0 = vld [vmem:[%s2971_s2] sm:$0xff]  ;;  %v62_v1 = vld [vmem:[%s2971_s2 + $0x8] sm:$0xff]  ;;  %vm91_vm0 = vcmask 785408   ;;  %v2544_v44 = vmov 0.0  }
  0x14   :  { %v63_v2 = vld [vmem:[%s2971_s2 + $0x10] sm:$0xff]  ;;  %v2243_v3 = vpack.c.bf16 %v62_v1, %v61_v0  ;;  %v64_v4 = vld [vmem:[%s2971_s2 + $0x18] sm:$0xff]  ;;  %v65_v6 = vld [vmem:[%s2971_s2 + $0x20] sm:$0xff]  ;;  %334 = vmatprep.mubr.f32.mxu1 %v2544_v44  ;;  %vm245_vm1 = vcmask 261120   ;;  %vm2546_vm2 = vmmov 0   ;;  %s2548_s21 = smov [#allocation5]  }
  0x15   :  { %v2247_v5 = vpack.c.bf16 %v64_v4, %v63_v2  ;;  %v66_v7 = vld [vmem:[%s2971_s2 + $0x28] sm:$0xff]  ;;  %v79_v8 = vld [vmem:[%s2969_s0] sm:$0xff]  ;;  %v67_v10 = vld [vmem:[%s2971_s2 + $0x30] sm:$0xff]  ;;  %s1944_s22 = sshll.u32 %s2548_s21, 4  ;;  %s1945_s22 = int_to_ptr.vmem [resolvable:$true] %s1944_s22 }
  0x16   :  { %2244 = vmatprep.subr.bf16.mxu0 %v2243_v3  ;;  %v2251_v9 = vpack.c.bf16 %v66_v7, %v65_v6  ;;  %2112 = vmatprep.mubr.msk.f32.mxu0 %vm91_vm0, %v79_v8  ;;  %v68_v11 = vld [vmem:[%s2971_s2 + $0x38] sm:$0xff]  ;;  %v30_v12 = vld [vmem:[#allocation2 + $0x8] sm:$0xff]  ;;  %v33_v13 = vld [vmem:[#allocation2 + $0x20] sm:$0xff]  ;;  %p2520_p9 = scmp.lt.s32.totalorder %s1945_s22, %s1945_s22 }
  0x17   :  { %2246 = vmatpush3.bf16.msra.mxu0 %v2243_v3  ;;  %v29_v14 = vld [vmem:[#allocation2] sm:$0xff]  ;;  %v32_v15 = vld [vmem:[#allocation2 + $0x18] sm:$0xff]  ;;  %v2267_v16 = vpack.c.bf16 %v33_v13, %v30_v12  ;;  %v2255_v18 = vpack.c.bf16 %v68_v11, %v67_v10  ;;  %v70_v20 = vld [vmem:[%s2971_s2 + $0x48] sm:$0xff] }
  0x18   :  { %2248 = vmatprep.subr.bf16.mxu0 %v2247_v5  ;;  %v2269_v17 = vpack.c.bf16 %v32_v15, %v29_v14  ;;  %v69_v19 = vld [vmem:[%s2971_s2 + $0x40] sm:$0xff]  ;;  %v71_v22 = vld [vmem:[%s2971_s2 + $0x50] sm:$0xff]  ;;  %v72_v23 = vld [vmem:[%s2971_s2 + $0x58] sm:$0xff]  ;;  %v2545_v15 = vmov 0.0|0.0  }
  0x19   :  { %2268 = vmatprep.subr.bf16.mxu1 %v2267_v16  ;;  %v2259_v21 = vpack.c.bf16 %v70_v20, %v69_v19  ;;  %v2263_v24 = vpack.c.bf16 %v72_v23, %v71_v22  ;;  %v31_v25 = vld [vmem:[#allocation2 + $0x10] sm:$0xff]  ;;  %v34_v26 = vld [vmem:[#allocation2 + $0x28] sm:$0xff]  ;;  %v82_v30 = vld [vmem:[%s2969_s0 + $0x18] sm:$0xff] }
  0x1a   :  { %2270 = vmatpush1.bf16.msra.mxu1 %v2269_v17  ;;  %v2275_v27 = vpack.c.bf16 %v34_v26, %v31_v25  ;;  %v80_v28 = vld [vmem:[%s2969_s0 + $0x8] sm:$0xff]  ;;  %v81_v29 = vld [vmem:[%s2969_s0 + $0x10] sm:$0xff]  ;;  %v83_v31 = vld [vmem:[%s2969_s0 + $0x20] sm:$0xff]  ;;  %v230_v25 = vlaneseq }
  0x1b   :  { %2250 = vmatpush3.bf16.msra.mxu0 %v2247_v5  ;;  %v84_v32 = vld [vmem:[%s2969_s0 + $0x28] sm:$0xff]  ;;  %v85_v33 = vld [vmem:[%s2969_s0 + $0x30] sm:$0xff]  ;;  %v86_v34 = vld [vmem:[%s2969_s0 + $0x38] sm:$0xff] }
  0x1c   :  { %2252 = vmatprep.subr.bf16.mxu0 %v2251_v9  ;;  %v36_v35 = vld [vmem:[#allocation2 + $0x38] sm:$0xff]  ;;  %v39_v36 = vld [vmem:[#allocation2 + $0x50] sm:$0xff]  ;;  %v38_v39 = vld [vmem:[#allocation2 + $0x48] sm:$0xff]  ;;  %v231_v26 = vshrl.u32 %v230_v25, 7 }
  0x1d   :  { %v2271_v37 = vpack.c.bf16 %v39_v36, %v36_v35  ;;  %v35_v38 = vld [vmem:[#allocation2 + $0x30] sm:$0xff]  ;;  %v37_v41 = vld [vmem:[#allocation2 + $0x40] sm:$0xff]  ;;  %v40_v42 = vld [vmem:[#allocation2 + $0x58] sm:$0xff] }
  0x1e   :  { %v2273_v40 = vpack.c.bf16 %v38_v39, %v35_v38  ;;  %v2279_v43 = vpack.c.bf16 %v40_v42, %v37_v41  ;;  %v42_v45 = vld [vmem:[#allocation2 + $0x68] sm:$0xff]  ;;  %v45_v46 = vld [vmem:[#allocation2 + $0x80] sm:$0xff]  ;;  %v44_v51 = vld [vmem:[#allocation2 + $0x78] sm:$0xff]  ;;  %v2547_v38 = vmov 0  }
  0x1f   :  { %2254 = vmatpush3.bf16.msra.mxu0 %v2251_v9  ;;  %2272 = vmatprep.subr.bf16.mxu1 %v2271_v37  ;;  %v2650_v47 = vpack.c.bf16 %v45_v46, %v42_v45  ;;  %v1953_v48 = vld [vmem:[%s2971_s2 + $0x80] ss:$0 sm:$0xff]  ;;  %v48_v54 = vld [vmem:[#allocation2 + $0x98] sm:$0xff]  ;;  %v51_v55 = vld [vmem:[#allocation2 + $0xb0] sm:$0xff] }
  0x20   :  { %2256 = vmatprep.subr.bf16.mxu0 %v2255_v18  ;;  %2274 = vmatpush1.bf16.msra.mxu1 %v2273_v40  ;;  %v41_v50 = vld [vmem:[#allocation2 + $0x60] sm:$0xff]  ;;  %v2659_v60 = vpack.c.bf16 %v51_v55, %v48_v54  ;;  %v47_v0 = vld [vmem:[#allocation2 + $0x90] sm:$0xff]  ;;  %v50_v1 = vld [vmem:[#allocation2 + $0xa8] sm:$0xff] }
  0x21   :  { %2284 = vmatprep.subr.bf16.mxu1 %v2650_v47  ;;  %v2657_v57 = vpack.c.bf16 %v44_v51, %v41_v50  ;;  %v2667_v6 = vpack.c.bf16 %v50_v1, %v47_v0  ;;  %v43_v19 = vld [vmem:[#allocation2 + $0x70] sm:$0xff]  ;;  %v46_v20 = vld [vmem:[#allocation2 + $0x88] sm:$0xff]  ;;  %v49_v22 = vld [vmem:[#allocation2 + $0xa0] sm:$0xff] }
  0x22   :  { %v52_v23 = vld [vmem:[#allocation2 + $0xb8] sm:$0xff] }
  0x23   :  { %2258 = vmatpush3.bf16.msra.mxu0 %v2255_v18 }
  0x24   :  { %2260 = vmatprep.subr.bf16.mxu0 %v2259_v21 }
  0x27   :  { %2262 = vmatpush3.bf16.msra.mxu0 %v2259_v21  ;;  %v2696_v21 = vpack.c.bf16 %v46_v20, %v43_v19 }
  0x28   :  { %2264 = vmatprep.subr.bf16.mxu0 %v2263_v24 }
  0x2b   :  { %2266 = vmatpush3.bf16.msra.mxu0 %v2263_v24  ;;  %v2700_v24 = vpack.c.bf16 %v52_v23, %v49_v22 }
  0x2c   :  { %2276 = vmatprep.subr.bf16.mxu0 %v2275_v27 }
  0x2e   :  { %2113 = vmatmul.mubr.msk.f32.vlgmr.msra.gmra.mrb[0].mxu0 %vm91_vm0, %v80_v28  ;;  %v54_v28 = vld [vmem:[#allocation2 + $0xc0] ss:$8 sm:$0x7] }
  0x2f   :  { %2115 = vmatprep.mubr.msk.f32.mxu0 %vm91_vm0, %v81_v29  ;;  %2278 = vmatpush3.bf16.msra.mxu0 %v2275_v27  ;;  %v240_v27 = vsub.s32 2, %v231_v26  ;;  %v56_v29 = vld [vmem:[#allocation2 + $0xc1] ss:$8 sm:$0x7] }
  0x30   :  { %2280 = vmatprep.subr.bf16.mxu0 %v2279_v43  ;;  %vm57_vm3 = vcmp.gt.f32.partialorder %v56_v29, 0.5 }
  0x31   :  { %v488_v39 = vsel %vm57_vm3, 1, %v2547_v38 }
  0x32   :  { %2116 = vmatmul.mubr.msk.f32.gmra.mrb[2].mxu0 %vm91_vm0, %v82_v30  ;;  %v241_v30 = vrot.slane %v54_v28, %v240_v27 }
  0x33   :  { %2118 = vmatprep.mubr.msk.f32.mxu0 %vm91_vm0, %v83_v31  ;;  %2282 = vmatpush3.bf16.msra.mxu0 %v2279_v43  ;;  %v232_v31 = vsub.s32 0, %v231_v26 }
  0x34   :  { %2298 = vmatprep.subr.bf16.mxu0 %v2650_v47 }
  0x35   :  { %v2718_v40 = vrot.slane %v54_v28, %v232_v31 }
  0x36   :  { %2119 = vmatmul.mubr.msk.f32.gmra.mrb[4].mxu0 %vm91_vm0, %v84_v32 }
  0x37   :  { %2121 = vmatprep.mubr.msk.f32.mxu0 %vm91_vm0, %v85_v33  ;;  %v236_v33 = vsub.s32 1, %v231_v26 }
  0x39   :  { %v2720_v41 = vrot.slane %v54_v28, %v236_v33 }
  0x3a   :  { %2122 = vmatmul.mubr.msk.f32.gmra.mrb[6].mxu0 %vm91_vm0, %v86_v34 }
 0x101   :  { %v2114_v49 = vpop.f32.mrb[0].mxu0 }
 0x102   :  { %v188_v52 = vadd.f32 %v2114_v49, %v1953_v48  ;;  %v182_v53 = vpop.f32.mrb[1].mxu0 }
 0x103   :  { %v183_v56 = vadd.f32 %v1953_v48, %v182_v53 }
 0x104   :  { %v222_v61 = vmax.f32 %v188_v52, 0.0 }
 0x105   :  { %v221_v58 = vmax.f32 %v183_v56, 0.0  ;;  %v2117_v59 = vpop.f32.mrb[2].mxu0 }
 0x106   :  { %v198_v62 = vadd.f32 %v2117_v59, %v1953_v48  ;;  %v192_v63 = vpop.f32.mrb[3].mxu0 }
 0x107   :  { %v193_v2 = vadd.f32 %v1953_v48, %v192_v63  ;;  %1962 = vmatmul.mubr.msk.f32.vlgmr.msra.gmra.mrb[0].mxu1 %vm245_vm1, %v221_v58  ;;  %2132 = vmatprep.mubr.msk.f32.mxu0 %vm245_vm1, %v221_v58 }
 0x108   :  { %v224_v3 = vmax.f32 %v198_v62, 0.0  ;;  %2286 = vmatpush1.bf16.msra.mxu1 %v2657_v57  ;;  %2133 = vmatmul.mubr.msk.f32.vlgmr.msra.gmra.mrb[8].mxu0 %vm245_vm1, %v222_v61 }
 0x109   :  { %v223_v4 = vmax.f32 %v193_v2, 0.0  ;;  %v2120_v5 = vpop.f32.mrb[4].mxu0  ;;  %340 = vmatprep.mubr.f32.mxu1 %v2544_v44  ;;  %2288 = vmatprep.subr.bf16.mxu1 %v2659_v60  ;;  %v492_v2 = vrot.slane %v488_v39, %v232_v31 }
 0x10a   :  { %v208_v7 = vadd.f32 %v2120_v5, %v1953_v48  ;;  %v202_v8 = vpop.f32.mrb[5].mxu0  ;;  %2300 = vmatpush1.bf16.msra.mxu0 %v2657_v57 }
 0x10b   :  { %v203_v9 = vadd.f32 %v1953_v48, %v202_v8  ;;  %1963 = vmatmul.mubr.msk.f32.gmra.mrb[2].mxu1 %vm245_vm1, %v222_v61  ;;  %2135 = vmatprep.mubr.msk.f32.mxu0 %vm245_vm1, %v223_v4  ;;  %vm501_vm5 = vcmp.eq.s32.totalorder %v492_v2, 1 }
 0x10c   :  { %v226_v10 = vmax.f32 %v208_v7, 0.0  ;;  %2136 = vmatmul.mubr.msk.f32.gmra.mrb[10].mxu0 %vm245_vm1, %v224_v3  ;;  %346 = vmatprep.mubr.f32.mxu1 %v2544_v44 }
 0x10d   :  { %v225_v11 = vmax.f32 %v203_v9, 0.0  ;;  %v2123_v12 = vpop.f32.mrb[6].mxu0  ;;  %2290 = vmatpush1.bf16.msra.mxu1 %v2667_v6  ;;  %2302 = vmatprep.subr.bf16.mxu0 %v2659_v60  ;;  %v496_v9 = vrot.slane %v488_v39, %v236_v33 }
 0x10e   :  { %v218_v13 = vadd.f32 %v2123_v12, %v1953_v48  ;;  %v212_v14 = vpop.f32.mrb[7].mxu0  ;;  %2291 = vmatprep.subr.bf16.mxu1 %v2545_v15  ;;  %2304 = vmatpush1.bf16.msra.mxu0 %v2667_v6 }
 0x10f   :  { %v213_v16 = vadd.f32 %v1953_v48, %v212_v14  ;;  %1964 = vmatmul.mubr.msk.f32.gmra.mrb[4].mxu1 %vm245_vm1, %v223_v4  ;;  %2138 = vmatprep.mubr.msk.f32.mxu0 %vm245_vm1, %v225_v11  ;;  %v500_v48 = vrot.slane %v488_v39, %v240_v27  ;;  %vm502_vm6 = vcmp.eq.s32.totalorder %v496_v9, 1  ;;  %v2812_v9 = vld [vmem:[#allocation2 + $0xe8] sm:$0xff] }
 0x110   :  { %v228_v17 = vmax.f32 %v218_v13, 0.0  ;;  %2139 = vmatmul.mubr.msk.f32.gmra.mrb[12].mxu0 %vm245_vm1, %v226_v10  ;;  %352 = vmatprep.mubr.f32.mxu1 %v2544_v44 }
 0x111   :  { %v227_v18 = vmax.f32 %v213_v16, 0.0  ;;  %2312 = vmatprep.subr.bf16.mxu0 %v2650_v47  ;;  %vm503_vm4 = vcmp.eq.s32.totalorder %v500_v48, 1 }
 0x113   :  { %1965 = vmatmul.mubr.msk.f32.gmra.mrb[6].mxu1 %vm245_vm1, %v224_v3  ;;  %2141 = vmatprep.mubr.msk.f32.mxu0 %vm245_vm1, %v227_v18 }
 0x114   :  { %2142 = vmatmul.mubr.msk.f32.gmra.mrb[14].mxu0 %vm245_vm1, %v228_v17  ;;  %358 = vmatprep.mubr.f32.mxu1 %v2544_v44 }
 0x115   :  { %760 = vmatprep.mubr.f32.mxu0 %v2544_v44 }
 0x117   :  { %1966 = vmatmul.mubr.msk.f32.gmra.mrb[8].mxu1 %vm245_vm1, %v225_v11 }
 0x118   :  { %364 = vmatprep.mubr.f32.mxu1 %v2544_v44 }
 0x11b   :  { %1967 = vmatmul.mubr.msk.f32.gmra.mrb[10].mxu1 %vm245_vm1, %v226_v10 }
 0x11c   :  { %370 = vmatprep.mubr.f32.mxu1 %v2544_v44 }
 0x11f   :  { %1968 = vmatmul.mubr.msk.f32.gmra.mrb[12].mxu1 %vm245_vm1, %v227_v18 }
 0x120   :  { %376 = vmatprep.mubr.f32.mxu1 %v2544_v44 }
 0x123   :  { %1969 = vmatmul.mubr.msk.f32.gmra.mrb[14].mxu1 %vm245_vm1, %v228_v17 }
 0x124   :  { %595 = vmatprep.mubr.f32.mxu1 %v2544_v44 }
 0x127   :  { %596 = vmatmul.mubr.f32.vlgmr.msra.gmra.mrb[16].mxu1 %v2544_v44 }
 0x128   :  { %2293 = vmatpush3.bf16.msra.mxu1 %v2696_v21  ;;  %2152 = vmatprep.mubr.msk.f32.mxu1 %vm2546_vm2, %v2544_v44 }
 0x129   :  { %2294 = vmatprep.subr.bf16.mxu1 %v2545_v15 }
 0x12c   :  { %2296 = vmatpush3.bf16.msra.mxu1 %v2700_v24 }
 0x12d   :  { %2305 = vmatprep.subr.bf16.mxu1 %v2545_v15 }
 0x12f   :  { %2153 = vmatmul.mubr.f32.vlgmr.msra.gmra.mrb[18].mxu1 %v2544_v44 }
 0x130   :  { %2307 = vmatpush3.bf16.msra.mxu1 %v2696_v21  ;;  %2163 = vmatprep.mubr.msk.f32.mxu1 %vm2546_vm2, %v2544_v44 }
 0x131   :  { %2308 = vmatprep.subr.bf16.mxu1 %v2545_v15 }
 0x134   :  { %2310 = vmatpush3.bf16.msra.mxu1 %v2700_v24 }
 0x135   :  { %2319 = vmatprep.subr.bf16.mxu1 %v2545_v15 }
 0x1da   :  { %v2714_v32 = vpop.f32.mrb[0].mxu1 }
 0x1db   :  { %v2716_v34 = vpop.f32.mrb[1].mxu1  ;;  %v2134_v35 = vpop.f32.mrb[8].mxu0 }
 0x1dc   :  { %v455_v36 = vadd.f32 %v2134_v35, %v241_v30  ;;  %v449_v37 = vpop.f32.mrb[9].mxu0 }
 0x1dd   :  { %v450_v10 = vadd.f32 %v449_v37, %v241_v30 }
 0x1de   :  { %v342_v42 = vpop.f32.mrb[2].mxu1 }
 0x1df   :  { %v343_v43 = vadd.f32 %v342_v42, %v2718_v40  ;;  %v344_v45 = vpop.f32.mrb[3].mxu1  ;;  %v2137_v46 = vpop.f32.mrb[10].mxu0 }
 0x1e0   :  { %v345_v49 = vadd.f32 %v344_v45, %v2720_v41  ;;  %v465_v50 = vadd.f32 %v2137_v46, %v241_v30  ;;  %v459_v51 = vpop.f32.mrb[11].mxu0 }
 0x1e1   :  { %v460_v52 = vadd.f32 %v459_v51, %v241_v30 }
 0x1e2   :  { %v348_v53 = vpop.f32.mrb[4].mxu1 }
 0x1e3   :  { %v349_v54 = vadd.f32 %v348_v53, %v2718_v40  ;;  %v350_v55 = vpop.f32.mrb[5].mxu1  ;;  %v2140_v56 = vpop.f32.mrb[12].mxu0 }
 0x1e4   :  { %v351_v58 = vadd.f32 %v350_v55, %v2720_v41  ;;  %v475_v59 = vadd.f32 %v2140_v56, %v241_v30  ;;  %v469_v61 = vpop.f32.mrb[13].mxu0  ;;  %v337_v55 = vadd.f32 %v2714_v32, %v2718_v40 }
 0x1e5   :  { %v470_v62 = vadd.f32 %v469_v61, %v241_v30 }
 0x1e6   :  { %v2727_v63 = vsel %vm503_vm4, %v460_v52, %v475_v59  ;;  %v2730_v0 = vsel %vm503_vm4, %v475_v59, %v460_v52  ;;  %v354_v1 = vpop.f32.mrb[6].mxu1  ;;  %v339_v59 = vadd.f32 %v2716_v34, %v2720_v41 }
 0x1e7   :  { %v2733_v3 = vsel %vm503_vm4, %v465_v50, %v470_v62  ;;  %v2736_v4 = vsel %vm503_vm4, %v470_v62, %v465_v50  ;;  %v355_v5 = vadd.f32 %v354_v1, %v2718_v40  ;;  %v356_v7 = vpop.f32.mrb[7].mxu1  ;;  %v2143_v8 = vpop.f32.mrb[14].mxu0  ;;  %v2798_v62 = vld [vmem:[#allocation2 + $0xd8] sm:$0xff]  ;;  %v2801_v1 = vld [vmem:[#allocation2 + $0xe0] sm:$0xff] }
 0x1e8   :  { %v357_v11 = vadd.f32 %v356_v7, %v2720_v41  ;;  %v485_v12 = vadd.f32 %v2143_v8, %v241_v30  ;;  %v479_v13 = vpop.f32.mrb[15].mxu0 }
 0x1e9   :  { %v480_v14 = vadd.f32 %v479_v13, %v241_v30 }
 0x1ea   :  { %v2741_v16 = vsel %vm503_vm4, %v450_v10, %v485_v12  ;;  %v2744_v17 = vsel %vm503_vm4, %v485_v12, %v450_v10  ;;  %v360_v18 = vpop.f32.mrb[8].mxu1 }
 0x1eb   :  { %v2747_v19 = vsel %vm503_vm4, %v455_v36, %v480_v14  ;;  %v2750_v20 = vsel %vm503_vm4, %v480_v14, %v455_v36  ;;  %v361_v22 = vadd.f32 %v360_v18, %v2718_v40  ;;  %v362_v23 = vpop.f32.mrb[9].mxu1 }
 0x1ec   :  { %v363_v25 = vadd.f32 %v362_v23, %v2720_v41 }
 0x1ed   :  { %v2755_v26 = vsel %vm501_vm5, %v355_v5, %v361_v22  ;;  %v2758_v27 = vsel %vm501_vm5, %v361_v22, %v355_v5 }
 0x1ee   :  { %v366_v28 = vpop.f32.mrb[10].mxu1  ;;  %v2761_v29 = vsel %vm502_vm6, %v357_v11, %v363_v25  ;;  %v2764_v30 = vsel %vm502_vm6, %v363_v25, %v357_v11 }
 0x1ef   :  { %v367_v31 = vadd.f32 %v366_v28, %v2718_v40  ;;  %v368_v33 = vpop.f32.mrb[11].mxu1 }
 0x1f0   :  { %v369_v35 = vadd.f32 %v368_v33, %v2720_v41 }
 0x1f1   :  { %v2769_v36 = vsel %vm501_vm5, %v349_v54, %v367_v31  ;;  %v2772_v37 = vsel %vm501_vm5, %v367_v31, %v349_v54 }
 0x1f2   :  { %v372_v38 = vpop.f32.mrb[12].mxu1  ;;  %v2775_v39 = vsel %vm502_vm6, %v351_v58, %v369_v35  ;;  %v2778_v42 = vsel %vm502_vm6, %v369_v35, %v351_v58 }
 0x1f3   :  { %v373_v45 = vadd.f32 %v372_v38, %v2718_v40  ;;  %v374_v46 = vpop.f32.mrb[13].mxu1 }
 0x1f4   :  { %v375_v48 = vadd.f32 %v374_v46, %v2720_v41 }
 0x1f5   :  { %v2783_v50 = vsel %vm501_vm5, %v343_v43, %v373_v45  ;;  %v2786_v51 = vsel %vm501_vm5, %v373_v45, %v343_v43 }
 0x1f6   :  { %v378_v52 = vpop.f32.mrb[14].mxu1  ;;  %v508_v53 = vsel %vm502_vm6, %v345_v49, %v375_v48  ;;  %v2790_v54 = vsel %vm502_vm6, %v375_v48, %v345_v49 }
 0x1f7   :  { %v379_v56 = vadd.f32 %v378_v52, %v2718_v40  ;;  %v380_v58 = vpop.f32.mrb[15].mxu1 }
 0x1f8   :  { %v381_v61 = vadd.f32 %v380_v58, %v2720_v41 }
 0x1f9   :  { %v504_v43 = vsel %vm501_vm5, %v337_v55, %v379_v56  ;;  %v2804_v49 = vsel %vm501_vm5, %v379_v56, %v337_v55 }
 0x1fa   :  { %v597_v5 = vpop.f32.mrb[16].mxu1  ;;  %v505_v32 = vsel %vm502_vm6, %v339_v59, %v381_v61  ;;  %v2808_v40 = vsel %vm502_vm6, %v381_v61, %v339_v59 }
 0x1fb   :  { %v598_v7 = vadd.f32 %v597_v5, %v2798_v62  ;;  %v599_v34 = vpop.f32.mrb[17].mxu1 }
 0x1fc   :  { %v600_v41 = vadd.f32 %v599_v34, %v2801_v1 }
 0x1fd   :  { %v672_v8 = vadd.f32 %v598_v7, %v504_v43 }
 0x1fe   :  { %v673_v10 = vadd.f32 %v600_v41, %v505_v32 }
 0x1ff   :  { %v1978_v11 = vmul.f32 -1.442695, %v672_v8 }
 0x200   :  { %v1979_v2 = vmul.f32 -1.442695, %v673_v10 }
 0x201   :  { %2409 = vpow2.f32 %v1978_v11 }
 0x202   :  { %v668_v12 = vpop.f32.mrb[18].mxu1  ;;  %2411 = vpow2.f32 %v1979_v2 }
 0x203   :  { %v2154_v13 = vpop.f32.mrb[19].mxu1  ;;  %v669_v25 = vadd.f32 %v668_v12, %v2812_v9 }
 0x20b   :  { %v2410_v14 = vpop.eup %2409 }
 0x20c   :  { %v680_v18 = vadd.f32 1.0, %v2410_v14  ;;  %v2412_v22 = vpop.eup %2411 }
 0x20d   :  { %v681_v23 = vadd.f32 1.0, %v2412_v22 }
 0x20e   :  { %2413 = vrcp.f32 %v680_v18 }
 0x20f   :  { %2415 = vrcp.f32 %v681_v23 }
 0x218   :  { %v2414_v28 = vpop.eup %2413 }
 0x219   :  { %v686_v31 = vmul.f32 %v2414_v28, %v669_v25  ;;  %v2416_v35 = vpop.eup %2415 }
 0x21a   :  { %v689_v38 = vsub.f32 1.0, %v2416_v35  ;;  %v691_v46 = vmul.f32 0.0, %v2416_v35 }
 0x21b   :  { %v687_v33 = vadd.f32 %v686_v31, %v2741_v16 }
 0x21d   :  { %2417 = vtanh.f32 %v687_v33 }
 0x227   :  { %v2418_v45 = vpop.eup %2417 }
 0x228   :  { %v690_v48 = vmul.f32 %v2418_v45, %v689_v38 }
 0x22a   :  { %v692_v52 = vadd.f32 %v691_v46, %v690_v48 }
 0x22c   :  { %1980 = vmatmul.mubr.msk.f32.vlgmr.msra.gmra.mrb[16].mxu0 %vm245_vm1, %v692_v52  ;;  %2164 = vmatmul.mubr.msk.f32.vlgmr.msra.gmra.mrb[20].mxu1 %vm245_vm1, %v692_v52 }
 0x22d   :  { %2314 = vmatpush1.bf16.msra.mxu0 %v2657_v57  ;;  %2321 = vmatpush3.bf16.msra.mxu1 %v2696_v21 }
 0x22e   :  { %2316 = vmatprep.subr.bf16.mxu0 %v2659_v60  ;;  %2322 = vmatprep.subr.bf16.mxu1 %v2545_v15 }
 0x22f   :  { %925 = vmatprep.mubr.f32.mxu0 %v2544_v44  ;;  %2174 = vmatprep.mubr.msk.f32.mxu1 %vm2546_vm2, %v2544_v44 }
 0x231   :  { %2318 = vmatpush1.bf16.msra.mxu0 %v2667_v6  ;;  %2324 = vmatpush3.bf16.msra.mxu1 %v2700_v24 }
 0x232   :  { %2326 = vmatprep.subr.bf16.mxu0 %v2650_v47  ;;  %2333 = vmatprep.subr.bf16.mxu1 %v2545_v15 }
 0x2ff   :  { %v762_v16 = vpop.f32.mrb[16].mxu0  ;;  %v833_v55 = vpop.f32.mrb[20].mxu1 }
 0x300   :  { %v763_v56 = vadd.f32 %v762_v16, %v2798_v62  ;;  %v764_v58 = vpop.f32.mrb[17].mxu0  ;;  %v2165_v59 = vpop.f32.mrb[21].mxu1  ;;  %v834_v11 = vadd.f32 %v833_v55, %v2812_v9 }
 0x301   :  { %v765_v61 = vadd.f32 %v764_v58, %v2801_v1 }
 0x302   :  { %v837_v43 = vadd.f32 %v763_v56, %v2783_v50 }
 0x303   :  { %v838_v5 = vadd.f32 %v765_v61, %v508_v53 }
 0x304   :  { %v1982_v32 = vmul.f32 -1.442695, %v837_v43 }
 0x305   :  { %v1983_v7 = vmul.f32 -1.442695, %v838_v5 }
 0x306   :  { %2419 = vpow2.f32 %v1982_v32 }
 0x307   :  { %2421 = vpow2.f32 %v1983_v7 }
 0x310   :  { %v2420_v34 = vpop.eup %2419 }
 0x311   :  { %v845_v41 = vadd.f32 1.0, %v2420_v34  ;;  %v2422_v8 = vpop.eup %2421 }
 0x312   :  { %v846_v10 = vadd.f32 1.0, %v2422_v8 }
 0x313   :  { %2423 = vrcp.f32 %v845_v41 }
 0x314   :  { %2425 = vrcp.f32 %v846_v10 }
 0x31d   :  { %v2424_v12 = vpop.eup %2423 }
 0x31e   :  { %v851_v13 = vmul.f32 %v2424_v12, %v834_v11  ;;  %v2426_v14 = vpop.eup %2425 }
 0x31f   :  { %v854_v50 = vsub.f32 1.0, %v2426_v14  ;;  %v856_v22 = vmul.f32 %v2426_v14, %v692_v52 }
 0x320   :  { %v852_v2 = vadd.f32 %v851_v13, %v2747_v19 }
 0x322   :  { %2427 = vtanh.f32 %v852_v2 }
 0x32c   :  { %v2428_v53 = vpop.eup %2427 }
 0x32d   :  { %v855_v18 = vmul.f32 %v2428_v53, %v854_v50 }
 0x32f   :  { %v857_v23 = vadd.f32 %v856_v22, %v855_v18 }
 0x331   :  { %1984 = vmatmul.mubr.msk.f32.vlgmr.msra.gmra.mrb[18].mxu0 %vm245_vm1, %v857_v23  ;;  %2175 = vmatmul.mubr.msk.f32.vlgmr.msra.gmra.mrb[22].mxu1 %vm245_vm1, %v857_v23 }
 0x332   :  { %2328 = vmatpush1.bf16.msra.mxu0 %v2657_v57  ;;  %2335 = vmatpush3.bf16.msra.mxu1 %v2696_v21 }
 0x333   :  { %2330 = vmatprep.subr.bf16.mxu0 %v2659_v60  ;;  %2336 = vmatprep.subr.bf16.mxu1 %v2545_v15 }
 0x334   :  { %1090 = vmatprep.mubr.f32.mxu0 %v2544_v44  ;;  %2185 = vmatprep.mubr.msk.f32.mxu1 %vm2546_vm2, %v2544_v44 }
 0x336   :  { %2332 = vmatpush1.bf16.msra.mxu0 %v2667_v6  ;;  %2338 = vmatpush3.bf16.msra.mxu1 %v2700_v24 }
 0x337   :  { %2340 = vmatprep.subr.bf16.mxu0 %v2650_v47  ;;  %2347 = vmatprep.subr.bf16.mxu1 %v2545_v15 }
 0x404   :  { %v927_v19 = vpop.f32.mrb[18].mxu0  ;;  %v998_v25 = vpop.f32.mrb[22].mxu1 }
 0x405   :  { %v928_v28 = vadd.f32 %v927_v19, %v2798_v62  ;;  %v929_v31 = vpop.f32.mrb[19].mxu0  ;;  %v2176_v33 = vpop.f32.mrb[23].mxu1  ;;  %v999_v58 = vadd.f32 %v998_v25, %v2812_v9 }
 0x406   :  { %v930_v35 = vadd.f32 %v929_v31, %v2801_v1 }
 0x407   :  { %v1002_v38 = vadd.f32 %v928_v28, %v2769_v36 }
 0x408   :  { %v1003_v45 = vadd.f32 %v930_v35, %v2775_v39 }
 0x409   :  { %v1986_v46 = vmul.f32 -1.442695, %v1002_v38 }
 0x40a   :  { %v1987_v48 = vmul.f32 -1.442695, %v1003_v45 }
 0x40b   :  { %2429 = vpow2.f32 %v1986_v46 }
 0x40c   :  { %2431 = vpow2.f32 %v1987_v48 }
 0x415   :  { %v2430_v52 = vpop.eup %2429 }
 0x416   :  { %v1010_v16 = vadd.f32 1.0, %v2430_v52  ;;  %v2432_v55 = vpop.eup %2431 }
 0x417   :  { %v1011_v56 = vadd.f32 1.0, %v2432_v55 }
 0x418   :  { %2433 = vrcp.f32 %v1010_v16 }
 0x419   :  { %2435 = vrcp.f32 %v1011_v56 }
 0x422   :  { %v2434_v59 = vpop.eup %2433 }
 0x423   :  { %v1016_v61 = vmul.f32 %v2434_v59, %v999_v58  ;;  %v2436_v36 = vpop.eup %2435 }
 0x424   :  { %v1019_v5 = vsub.f32 1.0, %v2436_v36  ;;  %v1021_v7 = vmul.f32 %v2436_v36, %v857_v23 }
 0x425   :  { %v1017_v43 = vadd.f32 %v1016_v61, %v2727_v63 }
 0x427   :  { %2437 = vtanh.f32 %v1017_v43 }
 0x431   :  { %v2438_v39 = vpop.eup %2437 }
 0x432   :  { %v1020_v32 = vmul.f32 %v2438_v39, %v1019_v5 }
 0x434   :  { %v1022_v34 = vadd.f32 %v1021_v7, %v1020_v32 }
 0x436   :  { %1988 = vmatmul.mubr.msk.f32.vlgmr.msra.gmra.mrb[20].mxu0 %vm245_vm1, %v1022_v34  ;;  %2186 = vmatmul.mubr.msk.f32.vlgmr.msra.gmra.mrb[24].mxu1 %vm245_vm1, %v1022_v34 }
 0x437   :  { %2342 = vmatpush1.bf16.msra.mxu0 %v2657_v57  ;;  %2349 = vmatpush3.bf16.msra.mxu1 %v2696_v21 }
 0x438   :  { %2344 = vmatprep.subr.bf16.mxu0 %v2659_v60  ;;  %2350 = vmatprep.subr.bf16.mxu1 %v2545_v15 }
 0x439   :  { %1255 = vmatprep.mubr.f32.mxu0 %v2544_v44  ;;  %2196 = vmatprep.mubr.msk.f32.mxu1 %vm2546_vm2, %v2544_v44 }
 0x43b   :  { %2346 = vmatpush1.bf16.msra.mxu0 %v2667_v6  ;;  %2352 = vmatpush3.bf16.msra.mxu1 %v2700_v24 }
 0x43c   :  { %2354 = vmatprep.subr.bf16.mxu0 %v2650_v47  ;;  %2361 = vmatprep.subr.bf16.mxu1 %v2545_v15 }
 0x509   :  { %v1092_v63 = vpop.f32.mrb[20].mxu0  ;;  %v1163_v41 = vpop.f32.mrb[24].mxu1 }
 0x50a   :  { %v1093_v8 = vadd.f32 %v1092_v63, %v2798_v62  ;;  %v1094_v10 = vpop.f32.mrb[21].mxu0  ;;  %v2187_v11 = vpop.f32.mrb[25].mxu1  ;;  %v1164_v19 = vadd.f32 %v1163_v41, %v2812_v9 }
 0x50b   :  { %v1095_v12 = vadd.f32 %v1094_v10, %v2801_v1 }
 0x50c   :  { %v1167_v13 = vadd.f32 %v1093_v8, %v2755_v26 }
 0x50d   :  { %v1168_v2 = vadd.f32 %v1095_v12, %v2761_v29 }
 0x50e   :  { %v1990_v14 = vmul.f32 -1.442695, %v1167_v13 }
 0x50f   :  { %v1991_v50 = vmul.f32 -1.442695, %v1168_v2 }
 0x510   :  { %2439 = vpow2.f32 %v1990_v14 }
 0x511   :  { %2441 = vpow2.f32 %v1991_v50 }
 0x51a   :  { %v2440_v53 = vpop.eup %2439 }
 0x51b   :  { %v1175_v18 = vadd.f32 1.0, %v2440_v53  ;;  %v2442_v22 = vpop.eup %2441 }
 0x51c   :  { %v1176_v23 = vadd.f32 1.0, %v2442_v22 }
 0x51d   :  { %2443 = vrcp.f32 %v1175_v18 }
 0x51e   :  { %2445 = vrcp.f32 %v1176_v23 }
 0x527   :  { %v2444_v25 = vpop.eup %2443 }
 0x528   :  { %v1181_v28 = vmul.f32 %v2444_v25, %v1164_v19  ;;  %v2446_v26 = vpop.eup %2445 }
 0x529   :  { %v1184_v33 = vsub.f32 1.0, %v2446_v26  ;;  %v1186_v38 = vmul.f32 %v2446_v26, %v1022_v34 }
 0x52a   :  { %v1182_v31 = vadd.f32 %v1181_v28, %v2733_v3 }
 0x52c   :  { %2447 = vtanh.f32 %v1182_v31 }
 0x536   :  { %v2448_v29 = vpop.eup %2447 }
 0x537   :  { %v1185_v35 = vmul.f32 %v2448_v29, %v1184_v33 }
 0x539   :  { %v1187_v45 = vadd.f32 %v1186_v38, %v1185_v35 }
 0x53b   :  { %1992 = vmatmul.mubr.msk.f32.vlgmr.msra.gmra.mrb[22].mxu0 %vm245_vm1, %v1187_v45  ;;  %2197 = vmatmul.mubr.msk.f32.vlgmr.msra.gmra.mrb[26].mxu1 %vm245_vm1, %v1187_v45 }
 0x53c   :  { %2356 = vmatpush1.bf16.msra.mxu0 %v2657_v57  ;;  %2363 = vmatpush3.bf16.msra.mxu1 %v2696_v21 }
 0x53d   :  { %2358 = vmatprep.subr.bf16.mxu0 %v2659_v60  ;;  %2364 = vmatprep.subr.bf16.mxu1 %v2545_v15 }
 0x53e   :  { %1420 = vmatprep.mubr.f32.mxu0 %v2544_v44  ;;  %2207 = vmatprep.mubr.msk.f32.mxu1 %vm2546_vm2, %v2544_v44 }
 0x540   :  { %2360 = vmatpush1.bf16.msra.mxu0 %v2667_v6  ;;  %2366 = vmatpush3.bf16.msra.mxu1 %v2700_v24 }
 0x541   :  { %2368 = vmatprep.subr.bf16.mxu0 %v2650_v47  ;;  %2375 = vmatprep.subr.bf16.mxu1 %v2545_v15 }
 0x60e   :  { %v1257_v3 = vpop.f32.mrb[22].mxu0  ;;  %v1328_v46 = vpop.f32.mrb[26].mxu1 }
 0x60f   :  { %v1258_v48 = vadd.f32 %v1257_v3, %v2798_v62  ;;  %v1259_v52 = vpop.f32.mrb[23].mxu0  ;;  %v2198_v16 = vpop.f32.mrb[27].mxu1  ;;  %v1329_v32 = vadd.f32 %v1328_v46, %v2812_v9 }
 0x610   :  { %v1260_v55 = vadd.f32 %v1259_v52, %v2801_v1 }
 0x611   :  { %v1332_v56 = vadd.f32 %v1258_v48, %v2758_v27 }
 0x612   :  { %v1333_v58 = vadd.f32 %v1260_v55, %v2764_v30 }
 0x613   :  { %v1994_v59 = vmul.f32 -1.442695, %v1332_v56 }
 0x614   :  { %v1995_v61 = vmul.f32 -1.442695, %v1333_v58 }
 0x615   :  { %2449 = vpow2.f32 %v1994_v59 }
 0x616   :  { %2451 = vpow2.f32 %v1995_v61 }
 0x61f   :  { %v2450_v43 = vpop.eup %2449 }
 0x620   :  { %v1340_v36 = vadd.f32 1.0, %v2450_v43  ;;  %v2452_v5 = vpop.eup %2451 }
 0x621   :  { %v1341_v39 = vadd.f32 1.0, %v2452_v5 }
 0x622   :  { %2453 = vrcp.f32 %v1340_v36 }
 0x623   :  { %2455 = vrcp.f32 %v1341_v39 }
 0x62c   :  { %v2454_v7 = vpop.eup %2453 }
 0x62d   :  { %v1346_v34 = vmul.f32 %v2454_v7, %v1329_v32  ;;  %v2456_v27 = vpop.eup %2455 }
 0x62e   :  { %v1349_v41 = vsub.f32 1.0, %v2456_v27  ;;  %v1351_v10 = vmul.f32 %v2456_v27, %v1187_v45  ;;  %v75_v27 = vld [vmem:[%s2971_s2 + $0x70] sm:$0xff] }
 0x62f   :  { %v1347_v63 = vadd.f32 %v1346_v34, %v2736_v4 }
 0x631   :  { %2457 = vtanh.f32 %v1347_v63  ;;  %v73_v63 = vld [vmem:[%s2971_s2 + $0x60] sm:$0xff] }
 0x63b   :  { %v2458_v30 = vpop.eup %2457 }
 0x63c   :  { %v1350_v8 = vmul.f32 %v2458_v30, %v1349_v41  ;;  %v76_v30 = vld [vmem:[%s2971_s2 + $0x78] sm:$0xff] }
 0x63e   :  { %v1352_v11 = vadd.f32 %v1351_v10, %v1350_v8  ;;  %v2399_v8 = vpack.c.bf16 %v76_v30, %v75_v27 }
 0x640   :  { %1996 = vmatmul.mubr.msk.f32.vlgmr.msra.gmra.mrb[24].mxu0 %vm245_vm1, %v1352_v11  ;;  %2208 = vmatmul.mubr.msk.f32.vlgmr.msra.gmra.mrb[28].mxu1 %vm245_vm1, %v1352_v11 }
 0x641   :  { %2370 = vmatpush1.bf16.msra.mxu0 %v2657_v57  ;;  %2377 = vmatpush3.bf16.msra.mxu1 %v2696_v21 }
 0x642   :  { %2372 = vmatprep.subr.bf16.mxu0 %v2659_v60  ;;  %2378 = vmatprep.subr.bf16.mxu1 %v2545_v15 }
 0x643   :  { %1585 = vmatprep.mubr.f32.mxu0 %v2544_v44  ;;  %2218 = vmatprep.mubr.msk.f32.mxu1 %vm2546_vm2, %v2544_v44 }
 0x645   :  { %2374 = vmatpush1.bf16.msra.mxu0 %v2667_v6  ;;  %2380 = vmatpush3.bf16.msra.mxu1 %v2700_v24 }
 0x646   :  { %2382 = vmatprep.subr.bf16.mxu0 %v2650_v47  ;;  %2389 = vmatprep.subr.bf16.mxu1 %v2545_v15 }
 0x713   :  { %v1422_v4 = vpop.f32.mrb[24].mxu0  ;;  %v1493_v12 = vpop.f32.mrb[28].mxu1 }
 0x714   :  { %v1423_v13 = vadd.f32 %v1422_v4, %v2798_v62  ;;  %v1424_v2 = vpop.f32.mrb[25].mxu0  ;;  %v2209_v14 = vpop.f32.mrb[29].mxu1  ;;  %v1494_v31 = vadd.f32 %v1493_v12, %v2812_v9 }
 0x715   :  { %v1425_v50 = vadd.f32 %v1424_v2, %v2801_v1 }
 0x716   :  { %v1497_v53 = vadd.f32 %v1423_v13, %v2772_v37 }
 0x717   :  { %v1498_v18 = vadd.f32 %v1425_v50, %v2778_v42 }
 0x718   :  { %v1998_v22 = vmul.f32 -1.442695, %v1497_v53 }
 0x719   :  { %v1999_v23 = vmul.f32 -1.442695, %v1498_v18 }
 0x71a   :  { %2459 = vpow2.f32 %v1998_v22 }
 0x71b   :  { %2461 = vpow2.f32 %v1999_v23 }
 0x724   :  { %v2460_v19 = vpop.eup %2459 }
 0x725   :  { %v1505_v47 = vadd.f32 1.0, %v2460_v19  ;;  %v2462_v25 = vpop.eup %2461 }
 0x726   :  { %v1506_v28 = vadd.f32 1.0, %v2462_v25 }
 0x727   :  { %2463 = vrcp.f32 %v1505_v47 }
 0x728   :  { %2465 = vrcp.f32 %v1506_v28 }
 0x731   :  { %v2464_v26 = vpop.eup %2463 }
 0x732   :  { %v1511_v33 = vmul.f32 %v2464_v26, %v1494_v31  ;;  %v2466_v37 = vpop.eup %2465 }
 0x733   :  { %v1514_v35 = vsub.f32 1.0, %v2466_v37  ;;  %v1516_v45 = vmul.f32 %v2466_v37, %v1352_v11 }
 0x734   :  { %v1512_v29 = vadd.f32 %v1511_v33, %v2730_v0  ;;  %v2008_v33 = vld [vmem:[%s2971_s2 + $0x81] ss:$0 sm:$0xff] }
 0x736   :  { %2467 = vtanh.f32 %v1512_v29 }
 0x740   :  { %v2468_v42 = vpop.eup %2467 }
 0x741   :  { %v1515_v38 = vmul.f32 %v2468_v42, %v1514_v35 }
 0x743   :  { %v1517_v3 = vadd.f32 %v1516_v45, %v1515_v38 }
 0x745   :  { %2000 = vmatmul.mubr.msk.f32.vlgmr.msra.gmra.mrb[26].mxu0 %vm245_vm1, %v1517_v3  ;;  %2219 = vmatmul.mubr.msk.f32.vlgmr.msra.gmra.mrb[30].mxu1 %vm245_vm1, %v1517_v3 }
 0x746   :  { %2384 = vmatpush1.bf16.msra.mxu0 %v2657_v57  ;;  %2391 = vmatpush3.bf16.msra.mxu1 %v2696_v21 }
 0x747   :  { %2386 = vmatprep.subr.bf16.mxu0 %v2659_v60  ;;  %2392 = vmatprep.subr.bf16.mxu1 %v2545_v15 }
 0x748   :  { %1750 = vmatprep.mubr.f32.mxu0 %v2544_v44  ;;  %2229 = vmatprep.mubr.msk.f32.mxu1 %vm2546_vm2, %v2544_v44 }
 0x74a   :  { %2388 = vmatpush1.bf16.msra.mxu0 %v2667_v6  ;;  %2394 = vmatpush3.bf16.msra.mxu1 %v2700_v24 }
 0x74b   :  { %2395 = vmatprep.subr.bf16.mxu0 %v2545_v15 }
 0x818   :  { %v1587_v0 = vpop.f32.mrb[26].mxu0  ;;  %v1658_v46 = vpop.f32.mrb[30].mxu1 }
 0x819   :  { %v1588_v57 = vadd.f32 %v1587_v0, %v2798_v62  ;;  %v1589_v21 = vpop.f32.mrb[27].mxu0  ;;  %v2220_v48 = vpop.f32.mrb[31].mxu1  ;;  %v1659_v61 = vadd.f32 %v1658_v46, %v2812_v9 }
 0x81a   :  { %v1590_v60 = vadd.f32 %v1589_v21, %v2801_v1 }
 0x81b   :  { %v1662_v52 = vadd.f32 %v1588_v57, %v2786_v51 }
 0x81c   :  { %v1663_v16 = vadd.f32 %v1590_v60, %v2790_v54 }
 0x81d   :  { %v2002_v55 = vmul.f32 -1.442695, %v1662_v52 }
 0x81e   :  { %v2003_v56 = vmul.f32 -1.442695, %v1663_v16 }
 0x81f   :  { %2469 = vpow2.f32 %v2002_v55 }
 0x820   :  { %2471 = vpow2.f32 %v2003_v56 }
 0x829   :  { %v2470_v6 = vpop.eup %2469 }
 0x82a   :  { %v1670_v24 = vadd.f32 1.0, %v2470_v6  ;;  %v2472_v58 = vpop.eup %2471 }
 0x82b   :  { %v1671_v59 = vadd.f32 1.0, %v2472_v58 }
 0x82c   :  { %2473 = vrcp.f32 %v1670_v24 }
 0x82d   :  { %2475 = vrcp.f32 %v1671_v59 }
 0x836   :  { %v2474_v43 = vpop.eup %2473 }
 0x837   :  { %v1676_v36 = vmul.f32 %v2474_v43, %v1659_v61  ;;  %v2476_v51 = vpop.eup %2475 }
 0x838   :  { %v1679_v39 = vsub.f32 1.0, %v2476_v51  ;;  %v1681_v7 = vmul.f32 %v2476_v51, %v1517_v3 }
 0x839   :  { %v1677_v5 = vadd.f32 %v1676_v36, %v2750_v20  ;;  %v74_v20 = vld [vmem:[%s2971_s2 + $0x68] sm:$0xff]  ;;  %s2515_s2 = scalar_lea.vmem %s1945_s22, 128 }
 0x83a   :  { %v2396_v41 = vpack.c.bf16 %v74_v20, %v73_v63  ;;  %p2516_p8 = scmp.ne.s32.totalorder %s1945_s22, %s2515_s2  ;;  %p2521_p10 = scmp.lt.s32.totalorder %s2515_s2, %s2515_s2 }
 0x83b   :  { %2477 = vtanh.f32 %v1677_v5 }
 0x83c   :  { %p2522_p11 = por %p2521_p10, %p2520_p9 }
 0x83e   :  { %p2523_p12 = pnand %p2522_p11, %p2516_p8 }
 0x845   :  { %v2478_v54 = vpop.eup %2477 }
 0x846   :  { %v1680_v32 = vmul.f32 %v2478_v54, %v1679_v39 }
 0x848   :  { %v1682_v34 = vadd.f32 %v1681_v7, %v1680_v32 }
 0x84a   :  { %2004 = vmatmul.mubr.msk.f32.vlgmr.msra.gmra.mrb[28].mxu0 %vm245_vm1, %v1682_v34  ;;  %2230 = vmatmul.mubr.msk.f32.vlgmr.msra.gmra.mrb[32].mxu1 %vm245_vm1, %v1682_v34 }
 0x84b   :  { %2240 = vmatprep.mubr.msk.f32.mxu0 %vm2546_vm2, %v2544_v44  ;;  %2397 = vmatpush3.bf16.msra.mxu0 %v2396_v41 }
 0x84c   :  { %2398 = vmatprep.subr.bf16.mxu0 %v2545_v15 }
 0x84f   :  { %2400 = vmatpush3.bf16.msra.mxu0 %v2399_v8 }
 0x91d   :  { %v1752_v44 = vpop.f32.mrb[28].mxu0  ;;  %v1823_v10 = vpop.f32.mrb[32].mxu1 }
 0x91e   :  { %v1753_v11 = vadd.f32 %v1752_v44, %v2798_v62  ;;  %v1754_v4 = vpop.f32.mrb[29].mxu0  ;;  %v2231_v12 = vpop.f32.mrb[33].mxu1  ;;  %v1824_v19 = vadd.f32 %v1823_v10, %v2812_v9 }
 0x91f   :  { %v1755_v13 = vadd.f32 %v1754_v4, %v2801_v1 }
 0x920   :  { %v1827_v2 = vadd.f32 %v1753_v11, %v2804_v49 }
 0x921   :  { %v1828_v14 = vadd.f32 %v1755_v13, %v2808_v40 }
 0x922   :  { %v2006_v50 = vmul.f32 -1.442695, %v1827_v2 }
 0x923   :  { %v2007_v53 = vmul.f32 -1.442695, %v1828_v14 }
 0x924   :  { %2479 = vpow2.f32 %v2006_v50 }
 0x925   :  { %2481 = vpow2.f32 %v2007_v53 }
 0x92e   :  { %v2480_v18 = vpop.eup %2479 }
 0x92f   :  { %v1835_v22 = vadd.f32 1.0, %v2480_v18  ;;  %v2482_v15 = vpop.eup %2481 }
 0x930   :  { %v1836_v23 = vadd.f32 1.0, %v2482_v15 }
 0x931   :  { %2483 = vrcp.f32 %v1835_v22 }
 0x932   :  { %2485 = vrcp.f32 %v1836_v23 }
 0x93b   :  { %v2484_v62 = vpop.eup %2483 }
 0x93c   :  { %v1841_v47 = vmul.f32 %v2484_v62, %v1824_v19  ;;  %v2486_v49 = vpop.eup %2485 }
 0x93d   :  { %v1844_v25 = vsub.f32 1.0, %v2486_v49  ;;  %v1846_v31 = vmul.f32 %v2486_v49, %v1682_v34 }
 0x93e   :  { %v1842_v1 = vadd.f32 %v1841_v47, %v2744_v17 }
 0x940   :  { %2487 = vtanh.f32 %v1842_v1 }
 0x94a   :  { %v2488_v40 = vpop.eup %2487 }
 0x94b   :  { %v1845_v28 = vmul.f32 %v2488_v40, %v1844_v25 }
 0x94d   :  { %v1847_v26 = vadd.f32 %v1846_v31, %v1845_v28 }
 0x94f   :  { %2241 = vmatmul.mubr.msk.f32.vlgmr.msra.gmra.mrb[30].mxu0 %vm245_vm1, %v1847_v26 }
 0xa22   :  { %v1921_v29 = vpop.f32.mrb[30].mxu0 }
 0xa23   :  { %v1922_v9 = vadd.f32 %v2008_v33, %v1921_v29  ;;  %v2242_v37 = vpop.f32.mrb[31].mxu0 }
 0xa25   :  { %2489 = vtanh.f32 %v1922_v9 }
 0xa2f   :  { %v2490_v35 = vpop.eup %2489 }
 0xa30   :  { %v2010_v42 = vclamps-f32 %v2490_v35, 2.0 }
 0xa32   :  { %v1928_v17 = vmul.f32 %v2010_v42, %v2010_v42 }
 0xa34   :  { %v1929_v38 = vsel %vm245_vm1, %v1928_v17, 0.0 }
 0xa35   :  { %1930 = vadd.xlane.f32.xlu0 %v1929_v38 }
 0xac2   :  { %v1931_v45 = vpop.xlane.xlu0 %1930 }
 0xac3   :  { %v1933_v3 = vmin.f32 %v1931_v45, 25.0  ;;  %vm1932_vm7 = vcmp.le.f32.partialorder %v1931_v45, 1.0 }
 0xac5   :  { %2491 = vrsqrt.f32 %v1933_v3 }
 0xacf   :  { %v2492_v0 = vpop.eup %2491 }
 0xad0   :  { %v1935_v46 = vsel %vm1932_vm7, 1.0, %v2492_v0 }
 0xad1   :  { %v1936_v57 = vmul.f32 %v2010_v42, %v1935_v46 }
 0xad3   :  { %1937 = vst.msk [vmem:[#allocation5] sm:$0xff] %vm245_vm1, %v1936_v57 }
 0xad4   :  { %2526 = shalt.err (!%p2523_p12)
}
 0xad5   :  { %s2527_s25 = scalar_lea.hbm %s2972_s3, 128 }
 0xad6   :  { %p2528_p13 = scmp.ne.s32.totalorder %s2972_s3, %s2527_s25  ;;  %p2531_p0 = scmp.lt.u32.totalorder %s2527_s25, %s2972_s3 }
 0xad8   :  { %p2533_p1 = pnand %p2531_p0, %p2528_p13 }
 0xada   :  { %2536 = shalt.err (!%p2533_p1)
}
 0xadb   :  { %1947 = dma.vmem_to_hbm [thread:$0]  %s1945_s22, 128, %s2972_s3, [#allocation4]  }
 0xadc   :  { %2539 = dma.done.wait [#allocation4], 128  }
 0xadd   :  { %2540 = vsyncadd [#allocation4], 4294967168 }
 0xade   :  { %1951 = vsyncpa [#allocation3], 1 }
 0xadf   :  { %1952 = vsyncpa [#allocation4], 1 }

</bundles_post_ra>
